<compile_context>
chip_gen: v7x
topology: tpu7x:2x2x1
jax: 0.10.0
libtpu: 0.0.40
codegen_flags: <defaults>
</compile_context>

<pallas_src>
import math
import functools

import jax
import jax.numpy as jnp
from jax.experimental import pallas as pl
from jax.experimental.pallas import tpu as pltpu

# ---------------------------------------------------------------------------
# Model hyper-parameters (small, synthetic — consistent with a tiny BERT)
# ---------------------------------------------------------------------------
VOCAB_SIZE = 100
MAX_POS = 16
EMBED_DIM = 32          # hidden size D
NUM_HEADS = 2
HEAD_DIM = EMBED_DIM // NUM_HEADS
FFN_DIM = 64
NUM_LAYERS = 2
NUM_CLASSES = 4
LN_EPS = 1e-12


# ---------------------------------------------------------------------------
# Single fused Pallas kernel (per batch element, grid over batch):
#   embedding-LN -> encoder stack -> pooler -> classifier head
# ---------------------------------------------------------------------------
def _fused_encoder_kernel(
        x_ref, bias_ref,
        emb_g_ref, emb_b_ref,
        wq_ref, wk_ref, wv_ref, bq_ref, bk_ref, bv_ref,
        wo_ref, bo_ref, ln1_g_ref, ln1_b_ref,
        w1_ref, b1_ref, w2_ref, b2_ref, ln2_g_ref, ln2_b_ref,
        wp_ref, bp_ref, wc_ref, bc_ref,
        o_ref,
        *, S, H, Dh, n_layers, eps):
    D = H * Dh
    scale = 1.0 / math.sqrt(Dh)
    bf16 = jnp.bfloat16
    f32 = jnp.float32

    def layernorm(x, g, b):
        mean = jnp.mean(x, axis=-1, keepdims=True)
        var = jnp.mean(jnp.square(x - mean), axis=-1, keepdims=True)
        return (x - mean) * jax.lax.rsqrt(var + eps) * g + b

    # Hoisted once: additive attention-mask bias broadcast to [S, S]
    # (JAX does not CSE broadcast_in_dim, so don't re-emit it per head/layer).
    bias_full = jnp.broadcast_to(bias_ref[0], (S, S))            # f32 [S, S]

    # Embedding LayerNorm (no residual — no zeros tensor materialized).
    h = layernorm(x_ref[0], emb_g_ref[...], emb_b_ref[...])      # f32 [S, D]

    # Encoder stack — statically unrolled (NUM_LAYERS=2): all stacked-weight
    # indices below are static, no dynamic addressing inside the kernel.
    for li in range(n_layers):
        h_bf = h.astype(bf16)
        attn_out = jnp.zeros((S, D), f32)

        # Per-head attention with pure 2-D matmuls.  Head weights were split
        # wrapper-side into stacked [L, H, ...] arrays, so there are no
        # 16-lane activation slices, no (B,S,Dh) reshapes and no lane concat:
        # the head merge is a per-head output projection summed into attn_out.
        for hh in range(H):
            q = (jnp.dot(h_bf, wq_ref[li, hh],
                         preferred_element_type=f32) + bq_ref[li, hh])
            k = (jnp.dot(h_bf, wk_ref[li, hh],
                         preferred_element_type=f32) + bk_ref[li, hh])
            v = (jnp.dot(h_bf, wv_ref[li, hh],
                         preferred_element_type=f32) + bv_ref[li, hh])

            s = jnp.einsum("qd,kd->qk", q.astype(bf16), k.astype(bf16),
                           preferred_element_type=f32) * scale + bias_full
            m = jnp.max(s, axis=-1, keepdims=True)
            p = jnp.exp(s - m)
            p = p * pl.reciprocal(jnp.sum(p, axis=-1, keepdims=True),
                                  approx=True)
            ctx = jnp.dot(p.astype(bf16), v.astype(bf16),
                          preferred_element_type=f32)             # [S, Dh]
            attn_out = attn_out + jnp.dot(ctx.astype(bf16), wo_ref[li, hh],
                                          preferred_element_type=f32)
        attn_out = attn_out + bo_ref[li]
        h = layernorm(attn_out + h, ln1_g_ref[li], ln1_b_ref[li])

        # Feed-forward.  Elementwise math (GELU/LN) kept in f32 (v5e VPU/EUP
        # have no bf16 path); only MXU operands are bf16.
        hid = (jnp.dot(h.astype(bf16), w1_ref[li],
                       preferred_element_type=f32) + b1_ref[li])
        c = math.sqrt(2.0 / math.pi)
        # TODO(synk): HF BERT default is exact erf GELU; tanh approx ~1e-3 off.
        hid = 0.5 * hid * (1.0 + jnp.tanh(c * (hid + 0.044715 * hid * hid * hid)))
        ffn_out = (jnp.dot(hid.astype(bf16), w2_ref[li],
                           preferred_element_type=f32) + b2_ref[li])
        h = layernorm(ffn_out + h, ln2_g_ref[li], ln2_b_ref[li])

    # CLS pooling: one row slice (this grid step owns exactly one example).
    cls = h[0:1, :]                                               # [1, D]
    pooled = jnp.tanh(
        jnp.dot(cls.astype(bf16), wp_ref[...],
                preferred_element_type=f32) + bp_ref[...])
    logits = (jnp.dot(pooled.astype(bf16), wc_ref[...],
                      preferred_element_type=f32) + bc_ref[...])  # [1, C]
    # TODO(synk): output is only C=4 lanes wide (masked vst); pad C to 128 or
    # move the head out of the kernel when scaling up.
    o_ref[...] = logits[None]                                     # [1, 1, C]


def _resident(shape):
    """Full-array VMEM block with a constant index map (weights stay resident)."""
    zero_idx = (0,) * len(shape)
    return pl.BlockSpec(shape, lambda b: zero_idx)


def fused_encoder(x, bias, p, *, B, S):
    D, H, Dh = EMBED_DIM, NUM_HEADS, HEAD_DIM
    F, C, L = FFN_DIM, NUM_CLASSES, NUM_LAYERS

    kernel = functools.partial(
        _fused_encoder_kernel, S=S, H=H, Dh=Dh, n_layers=L, eps=LN_EPS)

    in_specs = [
        pl.BlockSpec((1, S, D), lambda b: (b, 0, 0)),     # x        (per-example)
        pl.BlockSpec((1, 1, S), lambda b: (b, 0, 0)),     # mask bias(per-example)
        _resident((1, D)), _resident((1, D)),             # emb LN g/b
        _resident((L, H, D, Dh)), _resident((L, H, D, Dh)), _resident((L, H, D, Dh)),
        _resident((L, H, 1, Dh)), _resident((L, H, 1, Dh)), _resident((L, H, 1, Dh)),
        _resident((L, H, Dh, D)), _resident((L, 1, D)),   # wo, bo
        _resident((L, 1, D)), _resident((L, 1, D)),       # ln1 g/b
        _resident((L, D, F)), _resident((L, 1, F)),       # ffn1 w/b
        _resident((L, F, D)), _resident((L, 1, D)),       # ffn2 w/b
        _resident((L, 1, D)), _resident((L, 1, D)),       # ln2 g/b
        _resident((D, D)), _resident((1, D)),             # pooler w/b
        _resident((D, C)), _resident((1, C)),             # classifier w/b
    ]
    out_spec = pl.BlockSpec((1, 1, C), lambda b: (b, 0, 0))

    out = pl.pallas_call(
        kernel,
        grid=(B,),
        out_shape=jax.ShapeDtypeStruct((B, 1, C), jnp.float32),
        in_specs=in_specs,
        out_specs=out_spec,
        compiler_params=pltpu.CompilerParams(
            dimension_semantics=("parallel",)),   # v7x: shard batch over 2 TCs
    )(x, bias,
      p["emb_ln_g"], p["emb_ln_b"],
      p["wq"], p["wk"], p["wv"], p["bq"], p["bk"], p["bv"],
      p["wo"], p["bo"], p["ln1_g"], p["ln1_b"],
      p["w_ffn1"], p["b_ffn1"], p["w_ffn2"], p["b_ffn2"],
      p["ln2_g"], p["ln2_b"],
      p["pooler_w"], p["pooler_b"], p["cls_w"], p["cls_b"])
    return out.reshape(B, C)


# ---------------------------------------------------------------------------
# Parameter initialization (deterministic, synthetic).
# Matmul weights are stored in bf16 (MXU-native); LN params and additive
# biases stay f32.  Per-head weights are pre-split wrapper-side ([L, H, ...]).
# ---------------------------------------------------------------------------
def init_params(key):
    def normal(k, shape, scale=0.02, dtype=jnp.bfloat16):
        return (scale * jax.random.normal(k, shape, dtype=jnp.float32)).astype(dtype)

    L, D, H, Dh = NUM_LAYERS, EMBED_DIM, NUM_HEADS, HEAD_DIM
    F, C = FFN_DIM, NUM_CLASSES
    keys = jax.random.split(key, 10)
    return {
        "tok_emb": normal(keys[0], (VOCAB_SIZE, D), dtype=jnp.float32),
        "pos_emb": normal(keys[1], (MAX_POS, D), dtype=jnp.float32),
        "emb_ln_g": jnp.ones((1, D), jnp.float32),
        "emb_ln_b": jnp.zeros((1, D), jnp.float32),
        # per-layer, per-head weights stacked on leading [L, H] axes (bf16)
        "wq": normal(keys[2], (L, H, D, Dh)),
        "wk": normal(keys[3], (L, H, D, Dh)),
        "wv": normal(keys[4], (L, H, D, Dh)),
        "bq": jnp.zeros((L, H, 1, Dh), jnp.float32),
        "bk": jnp.zeros((L, H, 1, Dh), jnp.float32),
        "bv": jnp.zeros((L, H, 1, Dh), jnp.float32),
        "wo": normal(keys[5], (L, H, Dh, D)),
        "bo": jnp.zeros((L, 1, D), jnp.float32),
        "ln1_g": jnp.ones((L, 1, D), jnp.float32),
        "ln1_b": jnp.zeros((L, 1, D), jnp.float32),
        "w_ffn1": normal(keys[6], (L, D, F)),
        "b_ffn1": jnp.zeros((L, 1, F), jnp.float32),
        "w_ffn2": normal(keys[7], (L, F, D)),
        "b_ffn2": jnp.zeros((L, 1, D), jnp.float32),
        "ln2_g": jnp.ones((L, 1, D), jnp.float32),
        "ln2_b": jnp.zeros((L, 1, D), jnp.float32),
        "pooler_w": normal(keys[8], (D, D)),
        "pooler_b": jnp.zeros((1, D), jnp.float32),
        "cls_w": normal(keys[9], (D, C)),
        "cls_b": jnp.zeros((1, C), jnp.float32),
    }


# ---------------------------------------------------------------------------
# Forward pass:  (input_ids, attention_mask) -> logits [B, num_classes]
# ---------------------------------------------------------------------------
def transformer_text_classifier_forward(params, input_ids, attention_mask=None):
    B, S = input_ids.shape
    D = EMBED_DIM
    if attention_mask is None:
        attention_mask = jnp.ones((B, S), jnp.float32)

    # TODO(synk): embedding gather kept outside the Pallas kernel (DMA gather);
    # token_type embeddings of HF BERT are intentionally omitted (synthetic model).
    tok = jnp.take(params["tok_emb"], input_ids.reshape(-1), axis=0)
    tok = tok.reshape(B, S, D)
    pos = params["pos_emb"][:S][None, :, :]
    x = (tok + pos).astype(jnp.float32)                           # [B, S, D]

    # Additive mask bias: 0 for real tokens, -1e9 for padding.  [B, 1, S]
    bias = ((1.0 - attention_mask.astype(jnp.float32)) * -1e9).reshape(B, 1, S)

    return fused_encoder(x, bias, params, B=B, S=S)


# ---------------------------------------------------------------------------
if __name__ == "__main__":
    key = jax.random.PRNGKey(0)
    pkey, dkey = jax.random.split(key)
    params = init_params(pkey)

    B, S = 2, 8
    input_ids = jax.random.randint(dkey, (B, S), 0, VOCAB_SIZE, dtype=jnp.int32)
    # second example has its last two positions padded
    attention_mask = jnp.array(
        [[1, 1, 1, 1, 1, 1, 1, 1],
         [1, 1, 1, 1, 1, 1, 0, 0]], dtype=jnp.float32)

    fwd = jax.jit(transformer_text_classifier_forward)
    logits = fwd(params, input_ids, attention_mask)
    logits = jax.block_until_ready(logits)

    assert logits.shape == (B, NUM_CLASSES)
    assert logits.dtype == jnp.float32
    assert bool(jnp.all(jnp.isfinite(logits)))
    print("KERNEL_OK")
</pallas_src>

<mosaic_0001>
module attributes {stable_mosaic.version = 11 : i64} {
  func.func @_fused_encoder_kernel(%arg0: i32, %arg1: memref<1x8x32xf32, #tpu.memory_space<vmem>>, %arg2: memref<1x1x8xf32, #tpu.memory_space<vmem>>, %arg3: memref<1x32xf32, #tpu.memory_space<vmem>>, %arg4: memref<1x32xf32, #tpu.memory_space<vmem>>, %arg5: memref<2x2x32x16xbf16, #tpu.memory_space<vmem>>, %arg6: memref<2x2x32x16xbf16, #tpu.memory_space<vmem>>, %arg7: memref<2x2x32x16xbf16, #tpu.memory_space<vmem>>, %arg8: memref<2x2x1x16xf32, #tpu.memory_space<vmem>>, %arg9: memref<2x2x1x16xf32, #tpu.memory_space<vmem>>, %arg10: memref<2x2x1x16xf32, #tpu.memory_space<vmem>>, %arg11: memref<2x2x16x32xbf16, #tpu.memory_space<vmem>>, %arg12: memref<2x1x32xf32, #tpu.memory_space<vmem>>, %arg13: memref<2x1x32xf32, #tpu.memory_space<vmem>>, %arg14: memref<2x1x32xf32, #tpu.memory_space<vmem>>, %arg15: memref<2x32x64xbf16, #tpu.memory_space<vmem>>, %arg16: memref<2x1x64xf32, #tpu.memory_space<vmem>>, %arg17: memref<2x64x32xbf16, #tpu.memory_space<vmem>>, %arg18: memref<2x1x32xf32, #tpu.memory_space<vmem>>, %arg19: memref<2x1x32xf32, #tpu.memory_space<vmem>>, %arg20: memref<2x1x32xf32, #tpu.memory_space<vmem>>, %arg21: memref<32x32xbf16, #tpu.memory_space<vmem>>, %arg22: memref<1x32xf32, #tpu.memory_space<vmem>>, %arg23: memref<32x4xbf16, #tpu.memory_space<vmem>>, %arg24: memref<1x4xf32, #tpu.memory_space<vmem>>, %arg25: memref<1x1x4xf32, #tpu.memory_space<vmem>>) attributes {dimension_semantics = [#tpu.dimension_semantics<parallel>], iteration_bounds = array<i64: 2>, scalar_prefetch = 0 : i64, scratch_operands = 0 : i64, tpu.core_type = #tpu.core_type<tc>, window_params = [{transform_indices = @transform_0, window_bounds = array<i64: 1, 8, 32>}, {transform_indices = @transform_1, window_bounds = array<i64: 1, 1, 8>}, {pipeline_mode = #tpu.pipeline_mode<synchronous>, transform_indices = @transform_2, window_bounds = array<i64: 1, 32>}, {pipeline_mode = #tpu.pipeline_mode<synchronous>, transform_indices = @transform_3, window_bounds = array<i64: 1, 32>}, {pipeline_mode = #tpu.pipeline_mode<synchronous>, transform_indices = @transform_4, window_bounds = array<i64: 2, 2, 32, 16>}, {pipeline_mode = #tpu.pipeline_mode<synchronous>, transform_indices = @transform_5, window_bounds = array<i64: 2, 2, 32, 16>}, {pipeline_mode = #tpu.pipeline_mode<synchronous>, transform_indices = @transform_6, window_bounds = array<i64: 2, 2, 32, 16>}, {pipeline_mode = #tpu.pipeline_mode<synchronous>, transform_indices = @transform_7, window_bounds = array<i64: 2, 2, 1, 16>}, {pipeline_mode = #tpu.pipeline_mode<synchronous>, transform_indices = @transform_8, window_bounds = array<i64: 2, 2, 1, 16>}, {pipeline_mode = #tpu.pipeline_mode<synchronous>, transform_indices = @transform_9, window_bounds = array<i64: 2, 2, 1, 16>}, {pipeline_mode = #tpu.pipeline_mode<synchronous>, transform_indices = @transform_10, window_bounds = array<i64: 2, 2, 16, 32>}, {pipeline_mode = #tpu.pipeline_mode<synchronous>, transform_indices = @transform_11, window_bounds = array<i64: 2, 1, 32>}, {pipeline_mode = #tpu.pipeline_mode<synchronous>, transform_indices = @transform_12, window_bounds = array<i64: 2, 1, 32>}, {pipeline_mode = #tpu.pipeline_mode<synchronous>, transform_indices = @transform_13, window_bounds = array<i64: 2, 1, 32>}, {pipeline_mode = #tpu.pipeline_mode<synchronous>, transform_indices = @transform_14, window_bounds = array<i64: 2, 32, 64>}, {pipeline_mode = #tpu.pipeline_mode<synchronous>, transform_indices = @transform_15, window_bounds = array<i64: 2, 1, 64>}, {pipeline_mode = #tpu.pipeline_mode<synchronous>, transform_indices = @transform_16, window_bounds = array<i64: 2, 64, 32>}, {pipeline_mode = #tpu.pipeline_mode<synchronous>, transform_indices = @transform_17, window_bounds = array<i64: 2, 1, 32>}, {pipeline_mode = #tpu.pipeline_mode<synchronous>, transform_indices = @transform_18, window_bounds = array<i64: 2, 1, 32>}, {pipeline_mode = #tpu.pipeline_mode<synchronous>, transform_indices = @transform_19, window_bounds = array<i64: 2, 1, 32>}, {pipeline_mode = #tpu.pipeline_mode<synchronous>, transform_indices = @transform_20, window_bounds = array<i64: 32, 32>}, {pipeline_mode = #tpu.pipeline_mode<synchronous>, transform_indices = @transform_21, window_bounds = array<i64: 1, 32>}, {pipeline_mode = #tpu.pipeline_mode<synchronous>, transform_indices = @transform_22, window_bounds = array<i64: 32, 4>}, {pipeline_mode = #tpu.pipeline_mode<synchronous>, transform_indices = @transform_23, window_bounds = array<i64: 1, 4>}, {transform_indices = @transform_24, window_bounds = array<i64: 1, 1, 4>}]} {
    %c0 = arith.constant 0 : index
    %c0_0 = arith.constant 0 : index
    %c0_1 = arith.constant 0 : index
    %0 = vector.load %arg2[%c0, %c0_0, %c0_1] : memref<1x1x8xf32, #tpu.memory_space<vmem>>, vector<1x1x8xf32>
    %1 = vector.shape_cast %0 : vector<1x1x8xf32> to vector<1x8xf32>
    %2 = vector.shape_cast %1 : vector<1x8xf32> to vector<1x8xf32>
    %3 = vector.broadcast %2 : vector<1x8xf32> to vector<8x8xf32>
    %c0_2 = arith.constant 0 : index
    %c0_3 = arith.constant 0 : index
    %c0_4 = arith.constant 0 : index
    %4 = vector.load %arg1[%c0_2, %c0_3, %c0_4] : memref<1x8x32xf32, #tpu.memory_space<vmem>>, vector<1x8x32xf32>
    %5 = vector.shape_cast %4 : vector<1x8x32xf32> to vector<8x32xf32>
    %c0_5 = arith.constant 0 : index
    %c0_6 = arith.constant 0 : index
    %6 = vector.load %arg3[%c0_5, %c0_6] : memref<1x32xf32, #tpu.memory_space<vmem>>, vector<1x32xf32>
    %c0_7 = arith.constant 0 : index
    %c0_8 = arith.constant 0 : index
    %7 = vector.load %arg4[%c0_7, %c0_8] : memref<1x32xf32, #tpu.memory_space<vmem>>, vector<1x32xf32>
    %cst = arith.constant dense<0.000000e+00> : vector<8xf32>
    %8 = vector.multi_reduction <add>, %5, %cst [1] : vector<8x32xf32> to vector<8xf32>
    %9 = vector.shape_cast %8 : vector<8xf32> to vector<8x1xf32>
    %cst_9 = arith.constant 3.200000e+01 : f32
    %10 = vector.broadcast %cst_9 : f32 to vector<8x1xf32>
    %11 = arith.divf %9, %10 : vector<8x1xf32>
    %12 = vector.broadcast %11 : vector<8x1xf32> to vector<8x32xf32>
    %13 = arith.subf %5, %12 : vector<8x32xf32>
    %14 = arith.mulf %13, %13 : vector<8x32xf32>
    %cst_10 = arith.constant dense<0.000000e+00> : vector<8xf32>
    %15 = vector.multi_reduction <add>, %14, %cst_10 [1] : vector<8x32xf32> to vector<8xf32>
    %16 = vector.shape_cast %15 : vector<8xf32> to vector<8x1xf32>
    %cst_11 = arith.constant 3.200000e+01 : f32
    %17 = vector.broadcast %cst_11 : f32 to vector<8x1xf32>
    %18 = arith.divf %16, %17 : vector<8x1xf32>
    %19 = vector.broadcast %11 : vector<8x1xf32> to vector<8x32xf32>
    %20 = arith.subf %5, %19 : vector<8x32xf32>
    %cst_12 = arith.constant 9.99999996E-13 : f32
    %21 = vector.broadcast %cst_12 : f32 to vector<8x1xf32>
    %22 = arith.addf %18, %21 : vector<8x1xf32>
    %23 = math.rsqrt %22 : vector<8x1xf32>
    %24 = vector.broadcast %23 : vector<8x1xf32> to vector<8x32xf32>
    %25 = arith.mulf %20, %24 : vector<8x32xf32>
    %26 = vector.broadcast %6 : vector<1x32xf32> to vector<8x32xf32>
    %27 = arith.mulf %25, %26 : vector<8x32xf32>
    %28 = vector.broadcast %7 : vector<1x32xf32> to vector<8x32xf32>
    %29 = arith.addf %27, %28 : vector<8x32xf32>
    %30 = arith.truncf %29 : vector<8x32xf32> to vector<8x32xbf16>
    %cst_13 = arith.constant 0.000000e+00 : f32
    %31 = vector.broadcast %cst_13 : f32 to vector<8x32xf32>
    %c0_14 = arith.constant 0 : index
    %c0_15 = arith.constant 0 : index
    %c0_16 = arith.constant 0 : index
    %c0_17 = arith.constant 0 : index
    %32 = vector.load %arg5[%c0_14, %c0_15, %c0_16, %c0_17] : memref<2x2x32x16xbf16, #tpu.memory_space<vmem>>, vector<1x1x32x16xbf16>
    %33 = vector.shape_cast %32 : vector<1x1x32x16xbf16> to vector<32x16xbf16>
    %cst_18 = arith.constant dense<0.000000e+00> : vector<8x16xf32>
    %34 = tpu.matmul %30, %33, %cst_18 {dimension_numbers = #tpu.dot_dimension_numbers<[1], [0], [0], [1], [0, 0, 1, 1], [], []>} : vector<8x32xbf16>, vector<32x16xbf16>, vector<8x16xf32> -> vector<8x16xf32>
    %c0_19 = arith.constant 0 : index
    %c0_20 = arith.constant 0 : index
    %c0_21 = arith.constant 0 : index
    %c0_22 = arith.constant 0 : index
    %35 = vector.load %arg8[%c0_19, %c0_20, %c0_21, %c0_22] : memref<2x2x1x16xf32, #tpu.memory_space<vmem>>, vector<1x1x1x16xf32>
    %36 = vector.shape_cast %35 : vector<1x1x1x16xf32> to vector<1x16xf32>
    %37 = vector.broadcast %36 : vector<1x16xf32> to vector<8x16xf32>
    %38 = arith.addf %34, %37 : vector<8x16xf32>
    %c0_23 = arith.constant 0 : index
    %c0_24 = arith.constant 0 : index
    %c0_25 = arith.constant 0 : index
    %c0_26 = arith.constant 0 : index
    %39 = vector.load %arg6[%c0_23, %c0_24, %c0_25, %c0_26] : memref<2x2x32x16xbf16, #tpu.memory_space<vmem>>, vector<1x1x32x16xbf16>
    %40 = vector.shape_cast %39 : vector<1x1x32x16xbf16> to vector<32x16xbf16>
    %cst_27 = arith.constant dense<0.000000e+00> : vector<8x16xf32>
    %41 = tpu.matmul %30, %40, %cst_27 {dimension_numbers = #tpu.dot_dimension_numbers<[1], [0], [0], [1], [0, 0, 1, 1], [], []>} : vector<8x32xbf16>, vector<32x16xbf16>, vector<8x16xf32> -> vector<8x16xf32>
    %c0_28 = arith.constant 0 : index
    %c0_29 = arith.constant 0 : index
    %c0_30 = arith.constant 0 : index
    %c0_31 = arith.constant 0 : index
    %42 = vector.load %arg9[%c0_28, %c0_29, %c0_30, %c0_31] : memref<2x2x1x16xf32, #tpu.memory_space<vmem>>, vector<1x1x1x16xf32>
    %43 = vector.shape_cast %42 : vector<1x1x1x16xf32> to vector<1x16xf32>
    %44 = vector.broadcast %43 : vector<1x16xf32> to vector<8x16xf32>
    %45 = arith.addf %41, %44 : vector<8x16xf32>
    %c0_32 = arith.constant 0 : index
    %c0_33 = arith.constant 0 : index
    %c0_34 = arith.constant 0 : index
    %c0_35 = arith.constant 0 : index
    %46 = vector.load %arg7[%c0_32, %c0_33, %c0_34, %c0_35] : memref<2x2x32x16xbf16, #tpu.memory_space<vmem>>, vector<1x1x32x16xbf16>
    %47 = vector.shape_cast %46 : vector<1x1x32x16xbf16> to vector<32x16xbf16>
    %cst_36 = arith.constant dense<0.000000e+00> : vector<8x16xf32>
    %48 = tpu.matmul %30, %47, %cst_36 {dimension_numbers = #tpu.dot_dimension_numbers<[1], [0], [0], [1], [0, 0, 1, 1], [], []>} : vector<8x32xbf16>, vector<32x16xbf16>, vector<8x16xf32> -> vector<8x16xf32>
    %c0_37 = arith.constant 0 : index
    %c0_38 = arith.constant 0 : index
    %c0_39 = arith.constant 0 : index
    %c0_40 = arith.constant 0 : index
    %49 = vector.load %arg10[%c0_37, %c0_38, %c0_39, %c0_40] : memref<2x2x1x16xf32, #tpu.memory_space<vmem>>, vector<1x1x1x16xf32>
    %50 = vector.shape_cast %49 : vector<1x1x1x16xf32> to vector<1x16xf32>
    %51 = vector.broadcast %50 : vector<1x16xf32> to vector<8x16xf32>
    %52 = arith.addf %48, %51 : vector<8x16xf32>
    %53 = arith.truncf %38 : vector<8x16xf32> to vector<8x16xbf16>
    %54 = arith.truncf %45 : vector<8x16xf32> to vector<8x16xbf16>
    "tpu.trace_start"() <{level = 10 : i32, message = "qd,kd->qk"}> : () -> ()
    %cst_41 = arith.constant dense<0.000000e+00> : vector<8x8xf32>
    %55 = tpu.matmul %53, %54, %cst_41 {dimension_numbers = #tpu.dot_dimension_numbers<[1], [1], [0], [0], [0, 0, 1, 0], [], []>} : vector<8x16xbf16>, vector<8x16xbf16>, vector<8x8xf32> -> vector<8x8xf32>
    "tpu.trace_stop"() : () -> ()
    %cst_42 = arith.constant 2.500000e-01 : f32
    %56 = vector.broadcast %cst_42 : f32 to vector<8x8xf32>
    %57 = arith.mulf %55, %56 : vector<8x8xf32>
    %58 = arith.addf %57, %3 : vector<8x8xf32>
    %cst_43 = arith.constant dense<0xFF800000> : vector<8xf32>
    %59 = vector.multi_reduction <maximumf>, %58, %cst_43 [1] : vector<8x8xf32> to vector<8xf32>
    %60 = vector.shape_cast %59 : vector<8xf32> to vector<8x1xf32>
    %61 = vector.broadcast %60 : vector<8x1xf32> to vector<8x8xf32>
    %62 = arith.subf %58, %61 : vector<8x8xf32>
    %63 = math.exp %62 : vector<8x8xf32>
    %cst_44 = arith.constant dense<0.000000e+00> : vector<8xf32>
    %64 = vector.multi_reduction <add>, %63, %cst_44 [1] : vector<8x8xf32> to vector<8xf32>
    %65 = vector.shape_cast %64 : vector<8xf32> to vector<8x1xf32>
    %66 = tpu.reciprocal %65 {approx = true} : vector<8x1xf32> -> vector<8x1xf32>
    %67 = vector.broadcast %66 : vector<8x1xf32> to vector<8x8xf32>
    %68 = arith.mulf %63, %67 : vector<8x8xf32>
    %69 = arith.truncf %68 : vector<8x8xf32> to vector<8x8xbf16>
    %70 = arith.truncf %52 : vector<8x16xf32> to vector<8x16xbf16>
    %cst_45 = arith.constant dense<0.000000e+00> : vector<8x16xf32>
    %71 = tpu.matmul %69, %70, %cst_45 {dimension_numbers = #tpu.dot_dimension_numbers<[1], [0], [0], [1], [0, 0, 1, 1], [], []>} : vector<8x8xbf16>, vector<8x16xbf16>, vector<8x16xf32> -> vector<8x16xf32>
    %72 = arith.truncf %71 : vector<8x16xf32> to vector<8x16xbf16>
    %c0_46 = arith.constant 0 : index
    %c0_47 = arith.constant 0 : index
    %c0_48 = arith.constant 0 : index
    %c0_49 = arith.constant 0 : index
    %73 = vector.load %arg11[%c0_46, %c0_47, %c0_48, %c0_49] : memref<2x2x16x32xbf16, #tpu.memory_space<vmem>>, vector<1x1x16x32xbf16>
    %74 = vector.shape_cast %73 : vector<1x1x16x32xbf16> to vector<16x32xbf16>
    %cst_50 = arith.constant dense<0.000000e+00> : vector<8x32xf32>
    %75 = tpu.matmul %72, %74, %cst_50 {dimension_numbers = #tpu.dot_dimension_numbers<[1], [0], [0], [1], [0, 0, 1, 1], [], []>} : vector<8x16xbf16>, vector<16x32xbf16>, vector<8x32xf32> -> vector<8x32xf32>
    %76 = arith.addf %31, %75 : vector<8x32xf32>
    %c0_51 = arith.constant 0 : index
    %c1 = arith.constant 1 : index
    %c0_52 = arith.constant 0 : index
    %c0_53 = arith.constant 0 : index
    %77 = vector.load %arg5[%c0_51, %c1, %c0_52, %c0_53] : memref<2x2x32x16xbf16, #tpu.memory_space<vmem>>, vector<1x1x32x16xbf16>
    %78 = vector.shape_cast %77 : vector<1x1x32x16xbf16> to vector<32x16xbf16>
    %cst_54 = arith.constant dense<0.000000e+00> : vector<8x16xf32>
    %79 = tpu.matmul %30, %78, %cst_54 {dimension_numbers = #tpu.dot_dimension_numbers<[1], [0], [0], [1], [0, 0, 1, 1], [], []>} : vector<8x32xbf16>, vector<32x16xbf16>, vector<8x16xf32> -> vector<8x16xf32>
    %c0_55 = arith.constant 0 : index
    %c1_56 = arith.constant 1 : index
    %c0_57 = arith.constant 0 : index
    %c0_58 = arith.constant 0 : index
    %80 = vector.load %arg8[%c0_55, %c1_56, %c0_57, %c0_58] : memref<2x2x1x16xf32, #tpu.memory_space<vmem>>, vector<1x1x1x16xf32>
    %81 = vector.shape_cast %80 : vector<1x1x1x16xf32> to vector<1x16xf32>
    %82 = vector.broadcast %81 : vector<1x16xf32> to vector<8x16xf32>
    %83 = arith.addf %79, %82 : vector<8x16xf32>
    %c0_59 = arith.constant 0 : index
    %c1_60 = arith.constant 1 : index
    %c0_61 = arith.constant 0 : index
    %c0_62 = arith.constant 0 : index
    %84 = vector.load %arg6[%c0_59, %c1_60, %c0_61, %c0_62] : memref<2x2x32x16xbf16, #tpu.memory_space<vmem>>, vector<1x1x32x16xbf16>
    %85 = vector.shape_cast %84 : vector<1x1x32x16xbf16> to vector<32x16xbf16>
    %cst_63 = arith.constant dense<0.000000e+00> : vector<8x16xf32>
    %86 = tpu.matmul %30, %85, %cst_63 {dimension_numbers = #tpu.dot_dimension_numbers<[1], [0], [0], [1], [0, 0, 1, 1], [], []>} : vector<8x32xbf16>, vector<32x16xbf16>, vector<8x16xf32> -> vector<8x16xf32>
    %c0_64 = arith.constant 0 : index
    %c1_65 = arith.constant 1 : index
    %c0_66 = arith.constant 0 : index
    %c0_67 = arith.constant 0 : index
    %87 = vector.load %arg9[%c0_64, %c1_65, %c0_66, %c0_67] : memref<2x2x1x16xf32, #tpu.memory_space<vmem>>, vector<1x1x1x16xf32>
    %88 = vector.shape_cast %87 : vector<1x1x1x16xf32> to vector<1x16xf32>
    %89 = vector.broadcast %88 : vector<1x16xf32> to vector<8x16xf32>
    %90 = arith.addf %86, %89 : vector<8x16xf32>
    %c0_68 = arith.constant 0 : index
    %c1_69 = arith.constant 1 : index
    %c0_70 = arith.constant 0 : index
    %c0_71 = arith.constant 0 : index
    %91 = vector.load %arg7[%c0_68, %c1_69, %c0_70, %c0_71] : memref<2x2x32x16xbf16, #tpu.memory_space<vmem>>, vector<1x1x32x16xbf16>
    %92 = vector.shape_cast %91 : vector<1x1x32x16xbf16> to vector<32x16xbf16>
    %cst_72 = arith.constant dense<0.000000e+00> : vector<8x16xf32>
    %93 = tpu.matmul %30, %92, %cst_72 {dimension_numbers = #tpu.dot_dimension_numbers<[1], [0], [0], [1], [0, 0, 1, 1], [], []>} : vector<8x32xbf16>, vector<32x16xbf16>, vector<8x16xf32> -> vector<8x16xf32>
    %c0_73 = arith.constant 0 : index
    %c1_74 = arith.constant 1 : index
    %c0_75 = arith.constant 0 : index
    %c0_76 = arith.constant 0 : index
    %94 = vector.load %arg10[%c0_73, %c1_74, %c0_75, %c0_76] : memref<2x2x1x16xf32, #tpu.memory_space<vmem>>, vector<1x1x1x16xf32>
    %95 = vector.shape_cast %94 : vector<1x1x1x16xf32> to vector<1x16xf32>
    %96 = vector.broadcast %95 : vector<1x16xf32> to vector<8x16xf32>
    %97 = arith.addf %93, %96 : vector<8x16xf32>
    %98 = arith.truncf %83 : vector<8x16xf32> to vector<8x16xbf16>
    %99 = arith.truncf %90 : vector<8x16xf32> to vector<8x16xbf16>
    "tpu.trace_start"() <{level = 10 : i32, message = "qd,kd->qk"}> : () -> ()
    %cst_77 = arith.constant dense<0.000000e+00> : vector<8x8xf32>
    %100 = tpu.matmul %98, %99, %cst_77 {dimension_numbers = #tpu.dot_dimension_numbers<[1], [1], [0], [0], [0, 0, 1, 0], [], []>} : vector<8x16xbf16>, vector<8x16xbf16>, vector<8x8xf32> -> vector<8x8xf32>
    "tpu.trace_stop"() : () -> ()
    %cst_78 = arith.constant 2.500000e-01 : f32
    %101 = vector.broadcast %cst_78 : f32 to vector<8x8xf32>
    %102 = arith.mulf %100, %101 : vector<8x8xf32>
    %103 = arith.addf %102, %3 : vector<8x8xf32>
    %cst_79 = arith.constant dense<0xFF800000> : vector<8xf32>
    %104 = vector.multi_reduction <maximumf>, %103, %cst_79 [1] : vector<8x8xf32> to vector<8xf32>
    %105 = vector.shape_cast %104 : vector<8xf32> to vector<8x1xf32>
    %106 = vector.broadcast %105 : vector<8x1xf32> to vector<8x8xf32>
    %107 = arith.subf %103, %106 : vector<8x8xf32>
    %108 = math.exp %107 : vector<8x8xf32>
    %cst_80 = arith.constant dense<0.000000e+00> : vector<8xf32>
    %109 = vector.multi_reduction <add>, %108, %cst_80 [1] : vector<8x8xf32> to vector<8xf32>
    %110 = vector.shape_cast %109 : vector<8xf32> to vector<8x1xf32>
    %111 = tpu.reciprocal %110 {approx = true} : vector<8x1xf32> -> vector<8x1xf32>
    %112 = vector.broadcast %111 : vector<8x1xf32> to vector<8x8xf32>
    %113 = arith.mulf %108, %112 : vector<8x8xf32>
    %114 = arith.truncf %113 : vector<8x8xf32> to vector<8x8xbf16>
    %115 = arith.truncf %97 : vector<8x16xf32> to vector<8x16xbf16>
    %cst_81 = arith.constant dense<0.000000e+00> : vector<8x16xf32>
    %116 = tpu.matmul %114, %115, %cst_81 {dimension_numbers = #tpu.dot_dimension_numbers<[1], [0], [0], [1], [0, 0, 1, 1], [], []>} : vector<8x8xbf16>, vector<8x16xbf16>, vector<8x16xf32> -> vector<8x16xf32>
    %117 = arith.truncf %116 : vector<8x16xf32> to vector<8x16xbf16>
    %c0_82 = arith.constant 0 : index
    %c1_83 = arith.constant 1 : index
    %c0_84 = arith.constant 0 : index
    %c0_85 = arith.constant 0 : index
    %118 = vector.load %arg11[%c0_82, %c1_83, %c0_84, %c0_85] : memref<2x2x16x32xbf16, #tpu.memory_space<vmem>>, vector<1x1x16x32xbf16>
    %119 = vector.shape_cast %118 : vector<1x1x16x32xbf16> to vector<16x32xbf16>
    %cst_86 = arith.constant dense<0.000000e+00> : vector<8x32xf32>
    %120 = tpu.matmul %117, %119, %cst_86 {dimension_numbers = #tpu.dot_dimension_numbers<[1], [0], [0], [1], [0, 0, 1, 1], [], []>} : vector<8x16xbf16>, vector<16x32xbf16>, vector<8x32xf32> -> vector<8x32xf32>
    %121 = arith.addf %76, %120 : vector<8x32xf32>
    %c0_87 = arith.constant 0 : index
    %c0_88 = arith.constant 0 : index
    %c0_89 = arith.constant 0 : index
    %122 = vector.load %arg12[%c0_87, %c0_88, %c0_89] : memref<2x1x32xf32, #tpu.memory_space<vmem>>, vector<1x1x32xf32>
    %123 = vector.shape_cast %122 : vector<1x1x32xf32> to vector<1x32xf32>
    %124 = vector.broadcast %123 : vector<1x32xf32> to vector<8x32xf32>
    %125 = arith.addf %121, %124 : vector<8x32xf32>
    %126 = arith.addf %125, %29 : vector<8x32xf32>
    %c0_90 = arith.constant 0 : index
    %c0_91 = arith.constant 0 : index
    %c0_92 = arith.constant 0 : index
    %127 = vector.load %arg13[%c0_90, %c0_91, %c0_92] : memref<2x1x32xf32, #tpu.memory_space<vmem>>, vector<1x1x32xf32>
    %128 = vector.shape_cast %127 : vector<1x1x32xf32> to vector<1x32xf32>
    %c0_93 = arith.constant 0 : index
    %c0_94 = arith.constant 0 : index
    %c0_95 = arith.constant 0 : index
    %129 = vector.load %arg14[%c0_93, %c0_94, %c0_95] : memref<2x1x32xf32, #tpu.memory_space<vmem>>, vector<1x1x32xf32>
    %130 = vector.shape_cast %129 : vector<1x1x32xf32> to vector<1x32xf32>
    %cst_96 = arith.constant dense<0.000000e+00> : vector<8xf32>
    %131 = vector.multi_reduction <add>, %126, %cst_96 [1] : vector<8x32xf32> to vector<8xf32>
    %132 = vector.shape_cast %131 : vector<8xf32> to vector<8x1xf32>
    %cst_97 = arith.constant 3.200000e+01 : f32
    %133 = vector.broadcast %cst_97 : f32 to vector<8x1xf32>
    %134 = arith.divf %132, %133 : vector<8x1xf32>
    %135 = vector.broadcast %134 : vector<8x1xf32> to vector<8x32xf32>
    %136 = arith.subf %126, %135 : vector<8x32xf32>
    %137 = arith.mulf %136, %136 : vector<8x32xf32>
    %cst_98 = arith.constant dense<0.000000e+00> : vector<8xf32>
    %138 = vector.multi_reduction <add>, %137, %cst_98 [1] : vector<8x32xf32> to vector<8xf32>
    %139 = vector.shape_cast %138 : vector<8xf32> to vector<8x1xf32>
    %cst_99 = arith.constant 3.200000e+01 : f32
    %140 = vector.broadcast %cst_99 : f32 to vector<8x1xf32>
    %141 = arith.divf %139, %140 : vector<8x1xf32>
    %142 = vector.broadcast %134 : vector<8x1xf32> to vector<8x32xf32>
    %143 = arith.subf %126, %142 : vector<8x32xf32>
    %cst_100 = arith.constant 9.99999996E-13 : f32
    %144 = vector.broadcast %cst_100 : f32 to vector<8x1xf32>
    %145 = arith.addf %141, %144 : vector<8x1xf32>
    %146 = math.rsqrt %145 : vector<8x1xf32>
    %147 = vector.broadcast %146 : vector<8x1xf32> to vector<8x32xf32>
    %148 = arith.mulf %143, %147 : vector<8x32xf32>
    %149 = vector.broadcast %128 : vector<1x32xf32> to vector<8x32xf32>
    %150 = arith.mulf %148, %149 : vector<8x32xf32>
    %151 = vector.broadcast %130 : vector<1x32xf32> to vector<8x32xf32>
    %152 = arith.addf %150, %151 : vector<8x32xf32>
    %153 = arith.truncf %152 : vector<8x32xf32> to vector<8x32xbf16>
    %c0_101 = arith.constant 0 : index
    %c0_102 = arith.constant 0 : index
    %c0_103 = arith.constant 0 : index
    %154 = vector.load %arg15[%c0_101, %c0_102, %c0_103] : memref<2x32x64xbf16, #tpu.memory_space<vmem>>, vector<1x32x64xbf16>
    %155 = vector.shape_cast %154 : vector<1x32x64xbf16> to vector<32x64xbf16>
    %cst_104 = arith.constant dense<0.000000e+00> : vector<8x64xf32>
    %156 = tpu.matmul %153, %155, %cst_104 {dimension_numbers = #tpu.dot_dimension_numbers<[1], [0], [0], [1], [0, 0, 1, 1], [], []>} : vector<8x32xbf16>, vector<32x64xbf16>, vector<8x64xf32> -> vector<8x64xf32>
    %c0_105 = arith.constant 0 : index
    %c0_106 = arith.constant 0 : index
    %c0_107 = arith.constant 0 : index
    %157 = vector.load %arg16[%c0_105, %c0_106, %c0_107] : memref<2x1x64xf32, #tpu.memory_space<vmem>>, vector<1x1x64xf32>
    %158 = vector.shape_cast %157 : vector<1x1x64xf32> to vector<1x64xf32>
    %159 = vector.broadcast %158 : vector<1x64xf32> to vector<8x64xf32>
    %160 = arith.addf %156, %159 : vector<8x64xf32>
    %cst_108 = arith.constant 5.000000e-01 : f32
    %161 = vector.broadcast %cst_108 : f32 to vector<8x64xf32>
    %162 = arith.mulf %161, %160 : vector<8x64xf32>
    %cst_109 = arith.constant 4.471500e-02 : f32
    %163 = vector.broadcast %cst_109 : f32 to vector<8x64xf32>
    %164 = arith.mulf %163, %160 : vector<8x64xf32>
    %165 = arith.mulf %164, %160 : vector<8x64xf32>
    %166 = arith.mulf %165, %160 : vector<8x64xf32>
    %167 = arith.addf %160, %166 : vector<8x64xf32>
    %cst_110 = arith.constant 0.797884583 : f32
    %168 = vector.broadcast %cst_110 : f32 to vector<8x64xf32>
    %169 = arith.mulf %168, %167 : vector<8x64xf32>
    %170 = math.tanh %169 : vector<8x64xf32>
    %cst_111 = arith.constant 1.000000e+00 : f32
    %171 = vector.broadcast %cst_111 : f32 to vector<8x64xf32>
    %172 = arith.addf %171, %170 : vector<8x64xf32>
    %173 = arith.mulf %162, %172 : vector<8x64xf32>
    %174 = arith.truncf %173 : vector<8x64xf32> to vector<8x64xbf16>
    %c0_112 = arith.constant 0 : index
    %c0_113 = arith.constant 0 : index
    %c0_114 = arith.constant 0 : index
    %175 = vector.load %arg17[%c0_112, %c0_113, %c0_114] : memref<2x64x32xbf16, #tpu.memory_space<vmem>>, vector<1x64x32xbf16>
    %176 = vector.shape_cast %175 : vector<1x64x32xbf16> to vector<64x32xbf16>
    %cst_115 = arith.constant dense<0.000000e+00> : vector<8x32xf32>
    %177 = tpu.matmul %174, %176, %cst_115 {dimension_numbers = #tpu.dot_dimension_numbers<[1], [0], [0], [1], [0, 0, 1, 1], [], []>} : vector<8x64xbf16>, vector<64x32xbf16>, vector<8x32xf32> -> vector<8x32xf32>
    %c0_116 = arith.constant 0 : index
    %c0_117 = arith.constant 0 : index
    %c0_118 = arith.constant 0 : index
    %178 = vector.load %arg18[%c0_116, %c0_117, %c0_118] : memref<2x1x32xf32, #tpu.memory_space<vmem>>, vector<1x1x32xf32>
    %179 = vector.shape_cast %178 : vector<1x1x32xf32> to vector<1x32xf32>
    %180 = vector.broadcast %179 : vector<1x32xf32> to vector<8x32xf32>
    %181 = arith.addf %177, %180 : vector<8x32xf32>
    %182 = arith.addf %181, %152 : vector<8x32xf32>
    %c0_119 = arith.constant 0 : index
    %c0_120 = arith.constant 0 : index
    %c0_121 = arith.constant 0 : index
    %183 = vector.load %arg19[%c0_119, %c0_120, %c0_121] : memref<2x1x32xf32, #tpu.memory_space<vmem>>, vector<1x1x32xf32>
    %184 = vector.shape_cast %183 : vector<1x1x32xf32> to vector<1x32xf32>
    %c0_122 = arith.constant 0 : index
    %c0_123 = arith.constant 0 : index
    %c0_124 = arith.constant 0 : index
    %185 = vector.load %arg20[%c0_122, %c0_123, %c0_124] : memref<2x1x32xf32, #tpu.memory_space<vmem>>, vector<1x1x32xf32>
    %186 = vector.shape_cast %185 : vector<1x1x32xf32> to vector<1x32xf32>
    %cst_125 = arith.constant dense<0.000000e+00> : vector<8xf32>
    %187 = vector.multi_reduction <add>, %182, %cst_125 [1] : vector<8x32xf32> to vector<8xf32>
    %188 = vector.shape_cast %187 : vector<8xf32> to vector<8x1xf32>
    %cst_126 = arith.constant 3.200000e+01 : f32
    %189 = vector.broadcast %cst_126 : f32 to vector<8x1xf32>
    %190 = arith.divf %188, %189 : vector<8x1xf32>
    %191 = vector.broadcast %190 : vector<8x1xf32> to vector<8x32xf32>
    %192 = arith.subf %182, %191 : vector<8x32xf32>
    %193 = arith.mulf %192, %192 : vector<8x32xf32>
    %cst_127 = arith.constant dense<0.000000e+00> : vector<8xf32>
    %194 = vector.multi_reduction <add>, %193, %cst_127 [1] : vector<8x32xf32> to vector<8xf32>
    %195 = vector.shape_cast %194 : vector<8xf32> to vector<8x1xf32>
    %cst_128 = arith.constant 3.200000e+01 : f32
    %196 = vector.broadcast %cst_128 : f32 to vector<8x1xf32>
    %197 = arith.divf %195, %196 : vector<8x1xf32>
    %198 = vector.broadcast %190 : vector<8x1xf32> to vector<8x32xf32>
    %199 = arith.subf %182, %198 : vector<8x32xf32>
    %cst_129 = arith.constant 9.99999996E-13 : f32
    %200 = vector.broadcast %cst_129 : f32 to vector<8x1xf32>
    %201 = arith.addf %197, %200 : vector<8x1xf32>
    %202 = math.rsqrt %201 : vector<8x1xf32>
    %203 = vector.broadcast %202 : vector<8x1xf32> to vector<8x32xf32>
    %204 = arith.mulf %199, %203 : vector<8x32xf32>
    %205 = vector.broadcast %184 : vector<1x32xf32> to vector<8x32xf32>
    %206 = arith.mulf %204, %205 : vector<8x32xf32>
    %207 = vector.broadcast %186 : vector<1x32xf32> to vector<8x32xf32>
    %208 = arith.addf %206, %207 : vector<8x32xf32>
    %209 = arith.truncf %208 : vector<8x32xf32> to vector<8x32xbf16>
    %cst_130 = arith.constant 0.000000e+00 : f32
    %210 = vector.broadcast %cst_130 : f32 to vector<8x32xf32>
    %c1_131 = arith.constant 1 : index
    %c0_132 = arith.constant 0 : index
    %c0_133 = arith.constant 0 : index
    %c0_134 = arith.constant 0 : index
    %211 = vector.load %arg5[%c1_131, %c0_132, %c0_133, %c0_134] : memref<2x2x32x16xbf16, #tpu.memory_space<vmem>>, vector<1x1x32x16xbf16>
    %212 = vector.shape_cast %211 : vector<1x1x32x16xbf16> to vector<32x16xbf16>
    %cst_135 = arith.constant dense<0.000000e+00> : vector<8x16xf32>
    %213 = tpu.matmul %209, %212, %cst_135 {dimension_numbers = #tpu.dot_dimension_numbers<[1], [0], [0], [1], [0, 0, 1, 1], [], []>} : vector<8x32xbf16>, vector<32x16xbf16>, vector<8x16xf32> -> vector<8x16xf32>
    %c1_136 = arith.constant 1 : index
    %c0_137 = arith.constant 0 : index
    %c0_138 = arith.constant 0 : index
    %c0_139 = arith.constant 0 : index
    %214 = vector.load %arg8[%c1_136, %c0_137, %c0_138, %c0_139] : memref<2x2x1x16xf32, #tpu.memory_space<vmem>>, vector<1x1x1x16xf32>
    %215 = vector.shape_cast %214 : vector<1x1x1x16xf32> to vector<1x16xf32>
    %216 = vector.broadcast %215 : vector<1x16xf32> to vector<8x16xf32>
    %217 = arith.addf %213, %216 : vector<8x16xf32>
    %c1_140 = arith.constant 1 : index
    %c0_141 = arith.constant 0 : index
    %c0_142 = arith.constant 0 : index
    %c0_143 = arith.constant 0 : index
    %218 = vector.load %arg6[%c1_140, %c0_141, %c0_142, %c0_143] : memref<2x2x32x16xbf16, #tpu.memory_space<vmem>>, vector<1x1x32x16xbf16>
    %219 = vector.shape_cast %218 : vector<1x1x32x16xbf16> to vector<32x16xbf16>
    %cst_144 = arith.constant dense<0.000000e+00> : vector<8x16xf32>
    %220 = tpu.matmul %209, %219, %cst_144 {dimension_numbers = #tpu.dot_dimension_numbers<[1], [0], [0], [1], [0, 0, 1, 1], [], []>} : vector<8x32xbf16>, vector<32x16xbf16>, vector<8x16xf32> -> vector<8x16xf32>
    %c1_145 = arith.constant 1 : index
    %c0_146 = arith.constant 0 : index
    %c0_147 = arith.constant 0 : index
    %c0_148 = arith.constant 0 : index
    %221 = vector.load %arg9[%c1_145, %c0_146, %c0_147, %c0_148] : memref<2x2x1x16xf32, #tpu.memory_space<vmem>>, vector<1x1x1x16xf32>
    %222 = vector.shape_cast %221 : vector<1x1x1x16xf32> to vector<1x16xf32>
    %223 = vector.broadcast %222 : vector<1x16xf32> to vector<8x16xf32>
    %224 = arith.addf %220, %223 : vector<8x16xf32>
    %c1_149 = arith.constant 1 : index
    %c0_150 = arith.constant 0 : index
    %c0_151 = arith.constant 0 : index
    %c0_152 = arith.constant 0 : index
    %225 = vector.load %arg7[%c1_149, %c0_150, %c0_151, %c0_152] : memref<2x2x32x16xbf16, #tpu.memory_space<vmem>>, vector<1x1x32x16xbf16>
    %226 = vector.shape_cast %225 : vector<1x1x32x16xbf16> to vector<32x16xbf16>
    %cst_153 = arith.constant dense<0.000000e+00> : vector<8x16xf32>
    %227 = tpu.matmul %209, %226, %cst_153 {dimension_numbers = #tpu.dot_dimension_numbers<[1], [0], [0], [1], [0, 0, 1, 1], [], []>} : vector<8x32xbf16>, vector<32x16xbf16>, vector<8x16xf32> -> vector<8x16xf32>
    %c1_154 = arith.constant 1 : index
    %c0_155 = arith.constant 0 : index
    %c0_156 = arith.constant 0 : index
    %c0_157 = arith.constant 0 : index
    %228 = vector.load %arg10[%c1_154, %c0_155, %c0_156, %c0_157] : memref<2x2x1x16xf32, #tpu.memory_space<vmem>>, vector<1x1x1x16xf32>
    %229 = vector.shape_cast %228 : vector<1x1x1x16xf32> to vector<1x16xf32>
    %230 = vector.broadcast %229 : vector<1x16xf32> to vector<8x16xf32>
    %231 = arith.addf %227, %230 : vector<8x16xf32>
    %232 = arith.truncf %217 : vector<8x16xf32> to vector<8x16xbf16>
    %233 = arith.truncf %224 : vector<8x16xf32> to vector<8x16xbf16>
    "tpu.trace_start"() <{level = 10 : i32, message = "qd,kd->qk"}> : () -> ()
    %cst_158 = arith.constant dense<0.000000e+00> : vector<8x8xf32>
    %234 = tpu.matmul %232, %233, %cst_158 {dimension_numbers = #tpu.dot_dimension_numbers<[1], [1], [0], [0], [0, 0, 1, 0], [], []>} : vector<8x16xbf16>, vector<8x16xbf16>, vector<8x8xf32> -> vector<8x8xf32>
    "tpu.trace_stop"() : () -> ()
    %cst_159 = arith.constant 2.500000e-01 : f32
    %235 = vector.broadcast %cst_159 : f32 to vector<8x8xf32>
    %236 = arith.mulf %234, %235 : vector<8x8xf32>
    %237 = arith.addf %236, %3 : vector<8x8xf32>
    %cst_160 = arith.constant dense<0xFF800000> : vector<8xf32>
    %238 = vector.multi_reduction <maximumf>, %237, %cst_160 [1] : vector<8x8xf32> to vector<8xf32>
    %239 = vector.shape_cast %238 : vector<8xf32> to vector<8x1xf32>
    %240 = vector.broadcast %239 : vector<8x1xf32> to vector<8x8xf32>
    %241 = arith.subf %237, %240 : vector<8x8xf32>
    %242 = math.exp %241 : vector<8x8xf32>
    %cst_161 = arith.constant dense<0.000000e+00> : vector<8xf32>
    %243 = vector.multi_reduction <add>, %242, %cst_161 [1] : vector<8x8xf32> to vector<8xf32>
    %244 = vector.shape_cast %243 : vector<8xf32> to vector<8x1xf32>
    %245 = tpu.reciprocal %244 {approx = true} : vector<8x1xf32> -> vector<8x1xf32>
    %246 = vector.broadcast %245 : vector<8x1xf32> to vector<8x8xf32>
    %247 = arith.mulf %242, %246 : vector<8x8xf32>
    %248 = arith.truncf %247 : vector<8x8xf32> to vector<8x8xbf16>
    %249 = arith.truncf %231 : vector<8x16xf32> to vector<8x16xbf16>
    %cst_162 = arith.constant dense<0.000000e+00> : vector<8x16xf32>
    %250 = tpu.matmul %248, %249, %cst_162 {dimension_numbers = #tpu.dot_dimension_numbers<[1], [0], [0], [1], [0, 0, 1, 1], [], []>} : vector<8x8xbf16>, vector<8x16xbf16>, vector<8x16xf32> -> vector<8x16xf32>
    %251 = arith.truncf %250 : vector<8x16xf32> to vector<8x16xbf16>
    %c1_163 = arith.constant 1 : index
    %c0_164 = arith.constant 0 : index
    %c0_165 = arith.constant 0 : index
    %c0_166 = arith.constant 0 : index
    %252 = vector.load %arg11[%c1_163, %c0_164, %c0_165, %c0_166] : memref<2x2x16x32xbf16, #tpu.memory_space<vmem>>, vector<1x1x16x32xbf16>
    %253 = vector.shape_cast %252 : vector<1x1x16x32xbf16> to vector<16x32xbf16>
    %cst_167 = arith.constant dense<0.000000e+00> : vector<8x32xf32>
    %254 = tpu.matmul %251, %253, %cst_167 {dimension_numbers = #tpu.dot_dimension_numbers<[1], [0], [0], [1], [0, 0, 1, 1], [], []>} : vector<8x16xbf16>, vector<16x32xbf16>, vector<8x32xf32> -> vector<8x32xf32>
    %255 = arith.addf %210, %254 : vector<8x32xf32>
    %c1_168 = arith.constant 1 : index
    %c1_169 = arith.constant 1 : index
    %c0_170 = arith.constant 0 : index
    %c0_171 = arith.constant 0 : index
    %256 = vector.load %arg5[%c1_168, %c1_169, %c0_170, %c0_171] : memref<2x2x32x16xbf16, #tpu.memory_space<vmem>>, vector<1x1x32x16xbf16>
    %257 = vector.shape_cast %256 : vector<1x1x32x16xbf16> to vector<32x16xbf16>
    %cst_172 = arith.constant dense<0.000000e+00> : vector<8x16xf32>
    %258 = tpu.matmul %209, %257, %cst_172 {dimension_numbers = #tpu.dot_dimension_numbers<[1], [0], [0], [1], [0, 0, 1, 1], [], []>} : vector<8x32xbf16>, vector<32x16xbf16>, vector<8x16xf32> -> vector<8x16xf32>
    %c1_173 = arith.constant 1 : index
    %c1_174 = arith.constant 1 : index
    %c0_175 = arith.constant 0 : index
    %c0_176 = arith.constant 0 : index
    %259 = vector.load %arg8[%c1_173, %c1_174, %c0_175, %c0_176] : memref<2x2x1x16xf32, #tpu.memory_space<vmem>>, vector<1x1x1x16xf32>
    %260 = vector.shape_cast %259 : vector<1x1x1x16xf32> to vector<1x16xf32>
    %261 = vector.broadcast %260 : vector<1x16xf32> to vector<8x16xf32>
    %262 = arith.addf %258, %261 : vector<8x16xf32>
    %c1_177 = arith.constant 1 : index
    %c1_178 = arith.constant 1 : index
    %c0_179 = arith.constant 0 : index
    %c0_180 = arith.constant 0 : index
    %263 = vector.load %arg6[%c1_177, %c1_178, %c0_179, %c0_180] : memref<2x2x32x16xbf16, #tpu.memory_space<vmem>>, vector<1x1x32x16xbf16>
    %264 = vector.shape_cast %263 : vector<1x1x32x16xbf16> to vector<32x16xbf16>
    %cst_181 = arith.constant dense<0.000000e+00> : vector<8x16xf32>
    %265 = tpu.matmul %209, %264, %cst_181 {dimension_numbers = #tpu.dot_dimension_numbers<[1], [0], [0], [1], [0, 0, 1, 1], [], []>} : vector<8x32xbf16>, vector<32x16xbf16>, vector<8x16xf32> -> vector<8x16xf32>
    %c1_182 = arith.constant 1 : index
    %c1_183 = arith.constant 1 : index
    %c0_184 = arith.constant 0 : index
    %c0_185 = arith.constant 0 : index
    %266 = vector.load %arg9[%c1_182, %c1_183, %c0_184, %c0_185] : memref<2x2x1x16xf32, #tpu.memory_space<vmem>>, vector<1x1x1x16xf32>
    %267 = vector.shape_cast %266 : vector<1x1x1x16xf32> to vector<1x16xf32>
    %268 = vector.broadcast %267 : vector<1x16xf32> to vector<8x16xf32>
    %269 = arith.addf %265, %268 : vector<8x16xf32>
    %c1_186 = arith.constant 1 : index
    %c1_187 = arith.constant 1 : index
    %c0_188 = arith.constant 0 : index
    %c0_189 = arith.constant 0 : index
    %270 = vector.load %arg7[%c1_186, %c1_187, %c0_188, %c0_189] : memref<2x2x32x16xbf16, #tpu.memory_space<vmem>>, vector<1x1x32x16xbf16>
    %271 = vector.shape_cast %270 : vector<1x1x32x16xbf16> to vector<32x16xbf16>
    %cst_190 = arith.constant dense<0.000000e+00> : vector<8x16xf32>
    %272 = tpu.matmul %209, %271, %cst_190 {dimension_numbers = #tpu.dot_dimension_numbers<[1], [0], [0], [1], [0, 0, 1, 1], [], []>} : vector<8x32xbf16>, vector<32x16xbf16>, vector<8x16xf32> -> vector<8x16xf32>
    %c1_191 = arith.constant 1 : index
    %c1_192 = arith.constant 1 : index
    %c0_193 = arith.constant 0 : index
    %c0_194 = arith.constant 0 : index
    %273 = vector.load %arg10[%c1_191, %c1_192, %c0_193, %c0_194] : memref<2x2x1x16xf32, #tpu.memory_space<vmem>>, vector<1x1x1x16xf32>
    %274 = vector.shape_cast %273 : vector<1x1x1x16xf32> to vector<1x16xf32>
    %275 = vector.broadcast %274 : vector<1x16xf32> to vector<8x16xf32>
    %276 = arith.addf %272, %275 : vector<8x16xf32>
    %277 = arith.truncf %262 : vector<8x16xf32> to vector<8x16xbf16>
    %278 = arith.truncf %269 : vector<8x16xf32> to vector<8x16xbf16>
    "tpu.trace_start"() <{level = 10 : i32, message = "qd,kd->qk"}> : () -> ()
    %cst_195 = arith.constant dense<0.000000e+00> : vector<8x8xf32>
    %279 = tpu.matmul %277, %278, %cst_195 {dimension_numbers = #tpu.dot_dimension_numbers<[1], [1], [0], [0], [0, 0, 1, 0], [], []>} : vector<8x16xbf16>, vector<8x16xbf16>, vector<8x8xf32> -> vector<8x8xf32>
    "tpu.trace_stop"() : () -> ()
    %cst_196 = arith.constant 2.500000e-01 : f32
    %280 = vector.broadcast %cst_196 : f32 to vector<8x8xf32>
    %281 = arith.mulf %279, %280 : vector<8x8xf32>
    %282 = arith.addf %281, %3 : vector<8x8xf32>
    %cst_197 = arith.constant dense<0xFF800000> : vector<8xf32>
    %283 = vector.multi_reduction <maximumf>, %282, %cst_197 [1] : vector<8x8xf32> to vector<8xf32>
    %284 = vector.shape_cast %283 : vector<8xf32> to vector<8x1xf32>
    %285 = vector.broadcast %284 : vector<8x1xf32> to vector<8x8xf32>
    %286 = arith.subf %282, %285 : vector<8x8xf32>
    %287 = math.exp %286 : vector<8x8xf32>
    %cst_198 = arith.constant dense<0.000000e+00> : vector<8xf32>
    %288 = vector.multi_reduction <add>, %287, %cst_198 [1] : vector<8x8xf32> to vector<8xf32>
    %289 = vector.shape_cast %288 : vector<8xf32> to vector<8x1xf32>
    %290 = tpu.reciprocal %289 {approx = true} : vector<8x1xf32> -> vector<8x1xf32>
    %291 = vector.broadcast %290 : vector<8x1xf32> to vector<8x8xf32>
    %292 = arith.mulf %287, %291 : vector<8x8xf32>
    %293 = arith.truncf %292 : vector<8x8xf32> to vector<8x8xbf16>
    %294 = arith.truncf %276 : vector<8x16xf32> to vector<8x16xbf16>
    %cst_199 = arith.constant dense<0.000000e+00> : vector<8x16xf32>
    %295 = tpu.matmul %293, %294, %cst_199 {dimension_numbers = #tpu.dot_dimension_numbers<[1], [0], [0], [1], [0, 0, 1, 1], [], []>} : vector<8x8xbf16>, vector<8x16xbf16>, vector<8x16xf32> -> vector<8x16xf32>
    %296 = arith.truncf %295 : vector<8x16xf32> to vector<8x16xbf16>
    %c1_200 = arith.constant 1 : index
    %c1_201 = arith.constant 1 : index
    %c0_202 = arith.constant 0 : index
    %c0_203 = arith.constant 0 : index
    %297 = vector.load %arg11[%c1_200, %c1_201, %c0_202, %c0_203] : memref<2x2x16x32xbf16, #tpu.memory_space<vmem>>, vector<1x1x16x32xbf16>
    %298 = vector.shape_cast %297 : vector<1x1x16x32xbf16> to vector<16x32xbf16>
    %cst_204 = arith.constant dense<0.000000e+00> : vector<8x32xf32>
    %299 = tpu.matmul %296, %298, %cst_204 {dimension_numbers = #tpu.dot_dimension_numbers<[1], [0], [0], [1], [0, 0, 1, 1], [], []>} : vector<8x16xbf16>, vector<16x32xbf16>, vector<8x32xf32> -> vector<8x32xf32>
    %300 = arith.addf %255, %299 : vector<8x32xf32>
    %c1_205 = arith.constant 1 : index
    %c0_206 = arith.constant 0 : index
    %c0_207 = arith.constant 0 : index
    %301 = vector.load %arg12[%c1_205, %c0_206, %c0_207] : memref<2x1x32xf32, #tpu.memory_space<vmem>>, vector<1x1x32xf32>
    %302 = vector.shape_cast %301 : vector<1x1x32xf32> to vector<1x32xf32>
    %303 = vector.broadcast %302 : vector<1x32xf32> to vector<8x32xf32>
    %304 = arith.addf %300, %303 : vector<8x32xf32>
    %305 = arith.addf %304, %208 : vector<8x32xf32>
    %c1_208 = arith.constant 1 : index
    %c0_209 = arith.constant 0 : index
    %c0_210 = arith.constant 0 : index
    %306 = vector.load %arg13[%c1_208, %c0_209, %c0_210] : memref<2x1x32xf32, #tpu.memory_space<vmem>>, vector<1x1x32xf32>
    %307 = vector.shape_cast %306 : vector<1x1x32xf32> to vector<1x32xf32>
    %c1_211 = arith.constant 1 : index
    %c0_212 = arith.constant 0 : index
    %c0_213 = arith.constant 0 : index
    %308 = vector.load %arg14[%c1_211, %c0_212, %c0_213] : memref<2x1x32xf32, #tpu.memory_space<vmem>>, vector<1x1x32xf32>
    %309 = vector.shape_cast %308 : vector<1x1x32xf32> to vector<1x32xf32>
    %cst_214 = arith.constant dense<0.000000e+00> : vector<8xf32>
    %310 = vector.multi_reduction <add>, %305, %cst_214 [1] : vector<8x32xf32> to vector<8xf32>
    %311 = vector.shape_cast %310 : vector<8xf32> to vector<8x1xf32>
    %cst_215 = arith.constant 3.200000e+01 : f32
    %312 = vector.broadcast %cst_215 : f32 to vector<8x1xf32>
    %313 = arith.divf %311, %312 : vector<8x1xf32>
    %314 = vector.broadcast %313 : vector<8x1xf32> to vector<8x32xf32>
    %315 = arith.subf %305, %314 : vector<8x32xf32>
    %316 = arith.mulf %315, %315 : vector<8x32xf32>
    %cst_216 = arith.constant dense<0.000000e+00> : vector<8xf32>
    %317 = vector.multi_reduction <add>, %316, %cst_216 [1] : vector<8x32xf32> to vector<8xf32>
    %318 = vector.shape_cast %317 : vector<8xf32> to vector<8x1xf32>
    %cst_217 = arith.constant 3.200000e+01 : f32
    %319 = vector.broadcast %cst_217 : f32 to vector<8x1xf32>
    %320 = arith.divf %318, %319 : vector<8x1xf32>
    %321 = vector.broadcast %313 : vector<8x1xf32> to vector<8x32xf32>
    %322 = arith.subf %305, %321 : vector<8x32xf32>
    %cst_218 = arith.constant 9.99999996E-13 : f32
    %323 = vector.broadcast %cst_218 : f32 to vector<8x1xf32>
    %324 = arith.addf %320, %323 : vector<8x1xf32>
    %325 = math.rsqrt %324 : vector<8x1xf32>
    %326 = vector.broadcast %325 : vector<8x1xf32> to vector<8x32xf32>
    %327 = arith.mulf %322, %326 : vector<8x32xf32>
    %328 = vector.broadcast %307 : vector<1x32xf32> to vector<8x32xf32>
    %329 = arith.mulf %327, %328 : vector<8x32xf32>
    %330 = vector.broadcast %309 : vector<1x32xf32> to vector<8x32xf32>
    %331 = arith.addf %329, %330 : vector<8x32xf32>
    %332 = arith.truncf %331 : vector<8x32xf32> to vector<8x32xbf16>
    %c1_219 = arith.constant 1 : index
    %c0_220 = arith.constant 0 : index
    %c0_221 = arith.constant 0 : index
    %333 = vector.load %arg15[%c1_219, %c0_220, %c0_221] : memref<2x32x64xbf16, #tpu.memory_space<vmem>>, vector<1x32x64xbf16>
    %334 = vector.shape_cast %333 : vector<1x32x64xbf16> to vector<32x64xbf16>
    %cst_222 = arith.constant dense<0.000000e+00> : vector<8x64xf32>
    %335 = tpu.matmul %332, %334, %cst_222 {dimension_numbers = #tpu.dot_dimension_numbers<[1], [0], [0], [1], [0, 0, 1, 1], [], []>} : vector<8x32xbf16>, vector<32x64xbf16>, vector<8x64xf32> -> vector<8x64xf32>
    %c1_223 = arith.constant 1 : index
    %c0_224 = arith.constant 0 : index
    %c0_225 = arith.constant 0 : index
    %336 = vector.load %arg16[%c1_223, %c0_224, %c0_225] : memref<2x1x64xf32, #tpu.memory_space<vmem>>, vector<1x1x64xf32>
    %337 = vector.shape_cast %336 : vector<1x1x64xf32> to vector<1x64xf32>
    %338 = vector.broadcast %337 : vector<1x64xf32> to vector<8x64xf32>
    %339 = arith.addf %335, %338 : vector<8x64xf32>
    %cst_226 = arith.constant 5.000000e-01 : f32
    %340 = vector.broadcast %cst_226 : f32 to vector<8x64xf32>
    %341 = arith.mulf %340, %339 : vector<8x64xf32>
    %cst_227 = arith.constant 4.471500e-02 : f32
    %342 = vector.broadcast %cst_227 : f32 to vector<8x64xf32>
    %343 = arith.mulf %342, %339 : vector<8x64xf32>
    %344 = arith.mulf %343, %339 : vector<8x64xf32>
    %345 = arith.mulf %344, %339 : vector<8x64xf32>
    %346 = arith.addf %339, %345 : vector<8x64xf32>
    %cst_228 = arith.constant 0.797884583 : f32
    %347 = vector.broadcast %cst_228 : f32 to vector<8x64xf32>
    %348 = arith.mulf %347, %346 : vector<8x64xf32>
    %349 = math.tanh %348 : vector<8x64xf32>
    %cst_229 = arith.constant 1.000000e+00 : f32
    %350 = vector.broadcast %cst_229 : f32 to vector<8x64xf32>
    %351 = arith.addf %350, %349 : vector<8x64xf32>
    %352 = arith.mulf %341, %351 : vector<8x64xf32>
    %353 = arith.truncf %352 : vector<8x64xf32> to vector<8x64xbf16>
    %c1_230 = arith.constant 1 : index
    %c0_231 = arith.constant 0 : index
    %c0_232 = arith.constant 0 : index
    %354 = vector.load %arg17[%c1_230, %c0_231, %c0_232] : memref<2x64x32xbf16, #tpu.memory_space<vmem>>, vector<1x64x32xbf16>
    %355 = vector.shape_cast %354 : vector<1x64x32xbf16> to vector<64x32xbf16>
    %cst_233 = arith.constant dense<0.000000e+00> : vector<8x32xf32>
    %356 = tpu.matmul %353, %355, %cst_233 {dimension_numbers = #tpu.dot_dimension_numbers<[1], [0], [0], [1], [0, 0, 1, 1], [], []>} : vector<8x64xbf16>, vector<64x32xbf16>, vector<8x32xf32> -> vector<8x32xf32>
    %c1_234 = arith.constant 1 : index
    %c0_235 = arith.constant 0 : index
    %c0_236 = arith.constant 0 : index
    %357 = vector.load %arg18[%c1_234, %c0_235, %c0_236] : memref<2x1x32xf32, #tpu.memory_space<vmem>>, vector<1x1x32xf32>
    %358 = vector.shape_cast %357 : vector<1x1x32xf32> to vector<1x32xf32>
    %359 = vector.broadcast %358 : vector<1x32xf32> to vector<8x32xf32>
    %360 = arith.addf %356, %359 : vector<8x32xf32>
    %361 = arith.addf %360, %331 : vector<8x32xf32>
    %c1_237 = arith.constant 1 : index
    %c0_238 = arith.constant 0 : index
    %c0_239 = arith.constant 0 : index
    %362 = vector.load %arg19[%c1_237, %c0_238, %c0_239] : memref<2x1x32xf32, #tpu.memory_space<vmem>>, vector<1x1x32xf32>
    %363 = vector.shape_cast %362 : vector<1x1x32xf32> to vector<1x32xf32>
    %c1_240 = arith.constant 1 : index
    %c0_241 = arith.constant 0 : index
    %c0_242 = arith.constant 0 : index
    %364 = vector.load %arg20[%c1_240, %c0_241, %c0_242] : memref<2x1x32xf32, #tpu.memory_space<vmem>>, vector<1x1x32xf32>
    %365 = vector.shape_cast %364 : vector<1x1x32xf32> to vector<1x32xf32>
    %cst_243 = arith.constant dense<0.000000e+00> : vector<8xf32>
    %366 = vector.multi_reduction <add>, %361, %cst_243 [1] : vector<8x32xf32> to vector<8xf32>
    %367 = vector.shape_cast %366 : vector<8xf32> to vector<8x1xf32>
    %cst_244 = arith.constant 3.200000e+01 : f32
    %368 = vector.broadcast %cst_244 : f32 to vector<8x1xf32>
    %369 = arith.divf %367, %368 : vector<8x1xf32>
    %370 = vector.broadcast %369 : vector<8x1xf32> to vector<8x32xf32>
    %371 = arith.subf %361, %370 : vector<8x32xf32>
    %372 = arith.mulf %371, %371 : vector<8x32xf32>
    %cst_245 = arith.constant dense<0.000000e+00> : vector<8xf32>
    %373 = vector.multi_reduction <add>, %372, %cst_245 [1] : vector<8x32xf32> to vector<8xf32>
    %374 = vector.shape_cast %373 : vector<8xf32> to vector<8x1xf32>
    %cst_246 = arith.constant 3.200000e+01 : f32
    %375 = vector.broadcast %cst_246 : f32 to vector<8x1xf32>
    %376 = arith.divf %374, %375 : vector<8x1xf32>
    %377 = vector.broadcast %369 : vector<8x1xf32> to vector<8x32xf32>
    %378 = arith.subf %361, %377 : vector<8x32xf32>
    %cst_247 = arith.constant 9.99999996E-13 : f32
    %379 = vector.broadcast %cst_247 : f32 to vector<8x1xf32>
    %380 = arith.addf %376, %379 : vector<8x1xf32>
    %381 = math.rsqrt %380 : vector<8x1xf32>
    %382 = vector.broadcast %381 : vector<8x1xf32> to vector<8x32xf32>
    %383 = arith.mulf %378, %382 : vector<8x32xf32>
    %384 = vector.broadcast %363 : vector<1x32xf32> to vector<8x32xf32>
    %385 = arith.mulf %383, %384 : vector<8x32xf32>
    %386 = vector.broadcast %365 : vector<1x32xf32> to vector<8x32xf32>
    %387 = arith.addf %385, %386 : vector<8x32xf32>
    %388 = vector.extract_strided_slice %387 {offsets = [0, 0], sizes = [1, 32], strides = [1, 1]} : vector<8x32xf32> to vector<1x32xf32>
    %389 = arith.truncf %388 : vector<1x32xf32> to vector<1x32xbf16>
    %c0_248 = arith.constant 0 : index
    %c0_249 = arith.constant 0 : index
    %390 = vector.load %arg21[%c0_248, %c0_249] : memref<32x32xbf16, #tpu.memory_space<vmem>>, vector<32x32xbf16>
    %cst_250 = arith.constant dense<0.000000e+00> : vector<1x32xf32>
    %391 = tpu.matmul %389, %390, %cst_250 {dimension_numbers = #tpu.dot_dimension_numbers<[1], [0], [0], [1], [0, 0, 1, 1], [], []>} : vector<1x32xbf16>, vector<32x32xbf16>, vector<1x32xf32> -> vector<1x32xf32>
    %c0_251 = arith.constant 0 : index
    %c0_252 = arith.constant 0 : index
    %392 = vector.load %arg22[%c0_251, %c0_252] : memref<1x32xf32, #tpu.memory_space<vmem>>, vector<1x32xf32>
    %393 = arith.addf %391, %392 : vector<1x32xf32>
    %394 = math.tanh %393 : vector<1x32xf32>
    %395 = arith.truncf %394 : vector<1x32xf32> to vector<1x32xbf16>
    %c0_253 = arith.constant 0 : index
    %c0_254 = arith.constant 0 : index
    %396 = vector.load %arg23[%c0_253, %c0_254] : memref<32x4xbf16, #tpu.memory_space<vmem>>, vector<32x4xbf16>
    %cst_255 = arith.constant dense<0.000000e+00> : vector<1x4xf32>
    %397 = tpu.matmul %395, %396, %cst_255 {dimension_numbers = #tpu.dot_dimension_numbers<[1], [0], [0], [1], [0, 0, 1, 1], [], []>} : vector<1x32xbf16>, vector<32x4xbf16>, vector<1x4xf32> -> vector<1x4xf32>
    %c0_256 = arith.constant 0 : index
    %c0_257 = arith.constant 0 : index
    %398 = vector.load %arg24[%c0_256, %c0_257] : memref<1x4xf32, #tpu.memory_space<vmem>>, vector<1x4xf32>
    %399 = arith.addf %397, %398 : vector<1x4xf32>
    %400 = vector.shape_cast %399 : vector<1x4xf32> to vector<1x1x4xf32>
    %c0_258 = arith.constant 0 : index
    %c0_259 = arith.constant 0 : index
    %c0_260 = arith.constant 0 : index
    %401 = vector.load %arg25[%c0_258, %c0_259, %c0_260] : memref<1x1x4xf32, #tpu.memory_space<vmem>>, vector<1x1x4xf32>
    tpu.vector_store %arg25[%c0_258, %c0_259, %c0_260], %400 {strides = array<i32>} : memref<1x1x4xf32, #tpu.memory_space<vmem>>, vector<1x1x4xf32>,
    return
  }
  func.func @transform_0(%arg0: i32) -> (i32, i32, i32) {
    %c0_i32 = arith.constant 0 : i32
    %c0_i32_0 = arith.constant 0 : i32
    %c0_i32_1 = arith.constant 0 : i32
    return %arg0, %c0_i32, %c0_i32_0 : i32, i32, i32
  }
  func.func @transform_1(%arg0: i32) -> (i32, i32, i32) {
    %c0_i32 = arith.constant 0 : i32
    %c0_i32_0 = arith.constant 0 : i32
    %c0_i32_1 = arith.constant 0 : i32
    return %arg0, %c0_i32, %c0_i32_0 : i32, i32, i32
  }
  func.func @transform_2(%arg0: i32) -> (i32, i32) {
    %c0_i32 = arith.constant 0 : i32
    %c0_i32_0 = arith.constant 0 : i32
    %c0_i32_1 = arith.constant 0 : i32
    return %c0_i32, %c0_i32_0 : i32, i32
  }
  func.func @transform_3(%arg0: i32) -> (i32, i32) {
    %c0_i32 = arith.constant 0 : i32
    %c0_i32_0 = arith.constant 0 : i32
    %c0_i32_1 = arith.constant 0 : i32
    return %c0_i32, %c0_i32_0 : i32, i32
  }
  func.func @transform_4(%arg0: i32) -> (i32, i32, i32, i32) {
    %c0_i32 = arith.constant 0 : i32
    %c0_i32_0 = arith.constant 0 : i32
    %c0_i32_1 = arith.constant 0 : i32
    %c0_i32_2 = arith.constant 0 : i32
    %c0_i32_3 = arith.constant 0 : i32
    return %c0_i32, %c0_i32_0, %c0_i32_1, %c0_i32_2 : i32, i32, i32, i32
  }
  func.func @transform_5(%arg0: i32) -> (i32, i32, i32, i32) {
    %c0_i32 = arith.constant 0 : i32
    %c0_i32_0 = arith.constant 0 : i32
    %c0_i32_1 = arith.constant 0 : i32
    %c0_i32_2 = arith.constant 0 : i32
    %c0_i32_3 = arith.constant 0 : i32
    return %c0_i32, %c0_i32_0, %c0_i32_1, %c0_i32_2 : i32, i32, i32, i32
  }
  func.func @transform_6(%arg0: i32) -> (i32, i32, i32, i32) {
    %c0_i32 = arith.constant 0 : i32
    %c0_i32_0 = arith.constant 0 : i32
    %c0_i32_1 = arith.constant 0 : i32
    %c0_i32_2 = arith.constant 0 : i32
    %c0_i32_3 = arith.constant 0 : i32
    return %c0_i32, %c0_i32_0, %c0_i32_1, %c0_i32_2 : i32, i32, i32, i32
  }
  func.func @transform_7(%arg0: i32) -> (i32, i32, i32, i32) {
    %c0_i32 = arith.constant 0 : i32
    %c0_i32_0 = arith.constant 0 : i32
    %c0_i32_1 = arith.constant 0 : i32
    %c0_i32_2 = arith.constant 0 : i32
    %c0_i32_3 = arith.constant 0 : i32
    return %c0_i32, %c0_i32_0, %c0_i32_1, %c0_i32_2 : i32, i32, i32, i32
  }
  func.func @transform_8(%arg0: i32) -> (i32, i32, i32, i32) {
    %c0_i32 = arith.constant 0 : i32
    %c0_i32_0 = arith.constant 0 : i32
    %c0_i32_1 = arith.constant 0 : i32
    %c0_i32_2 = arith.constant 0 : i32
    %c0_i32_3 = arith.constant 0 : i32
    return %c0_i32, %c0_i32_0, %c0_i32_1, %c0_i32_2 : i32, i32, i32, i32
  }
  func.func @transform_9(%arg0: i32) -> (i32, i32, i32, i32) {
    %c0_i32 = arith.constant 0 : i32
    %c0_i32_0 = arith.constant 0 : i32
    %c0_i32_1 = arith.constant 0 : i32
    %c0_i32_2 = arith.constant 0 : i32
    %c0_i32_3 = arith.constant 0 : i32
    return %c0_i32, %c0_i32_0, %c0_i32_1, %c0_i32_2 : i32, i32, i32, i32
  }
  func.func @transform_10(%arg0: i32) -> (i32, i32, i32, i32) {
    %c0_i32 = arith.constant 0 : i32
    %c0_i32_0 = arith.constant 0 : i32
    %c0_i32_1 = arith.constant 0 : i32
    %c0_i32_2 = arith.constant 0 : i32
    %c0_i32_3 = arith.constant 0 : i32
    return %c0_i32, %c0_i32_0, %c0_i32_1, %c0_i32_2 : i32, i32, i32, i32
  }
  func.func @transform_11(%arg0: i32) -> (i32, i32, i32) {
    %c0_i32 = arith.constant 0 : i32
    %c0_i32_0 = arith.constant 0 : i32
    %c0_i32_1 = arith.constant 0 : i32
    %c0_i32_2 = arith.constant 0 : i32
    return %c0_i32, %c0_i32_0, %c0_i32_1 : i32, i32, i32
  }
  func.func @transform_12(%arg0: i32) -> (i32, i32, i32) {
    %c0_i32 = arith.constant 0 : i32
    %c0_i32_0 = arith.constant 0 : i32
    %c0_i32_1 = arith.constant 0 : i32
    %c0_i32_2 = arith.constant 0 : i32
    return %c0_i32, %c0_i32_0, %c0_i32_1 : i32, i32, i32
  }
  func.func @transform_13(%arg0: i32) -> (i32, i32, i32) {
    %c0_i32 = arith.constant 0 : i32
    %c0_i32_0 = arith.constant 0 : i32
    %c0_i32_1 = arith.constant 0 : i32
    %c0_i32_2 = arith.constant 0 : i32
    return %c0_i32, %c0_i32_0, %c0_i32_1 : i32, i32, i32
  }
  func.func @transform_14(%arg0: i32) -> (i32, i32, i32) {
    %c0_i32 = arith.constant 0 : i32
    %c0_i32_0 = arith.constant 0 : i32
    %c0_i32_1 = arith.constant 0 : i32
    %c0_i32_2 = arith.constant 0 : i32
    return %c0_i32, %c0_i32_0, %c0_i32_1 : i32, i32, i32
  }
  func.func @transform_15(%arg0: i32) -> (i32, i32, i32) {
    %c0_i32 = arith.constant 0 : i32
    %c0_i32_0 = arith.constant 0 : i32
    %c0_i32_1 = arith.constant 0 : i32
    %c0_i32_2 = arith.constant 0 : i32
    return %c0_i32, %c0_i32_0, %c0_i32_1 : i32, i32, i32
  }
  func.func @transform_16(%arg0: i32) -> (i32, i32, i32) {
    %c0_i32 = arith.constant 0 : i32
    %c0_i32_0 = arith.constant 0 : i32
    %c0_i32_1 = arith.constant 0 : i32
    %c0_i32_2 = arith.constant 0 : i32
    return %c0_i32, %c0_i32_0, %c0_i32_1 : i32, i32, i32
  }
  func.func @transform_17(%arg0: i32) -> (i32, i32, i32) {
    %c0_i32 = arith.constant 0 : i32
    %c0_i32_0 = arith.constant 0 : i32
    %c0_i32_1 = arith.constant 0 : i32
    %c0_i32_2 = arith.constant 0 : i32
    return %c0_i32, %c0_i32_0, %c0_i32_1 : i32, i32, i32
  }
  func.func @transform_18(%arg0: i32) -> (i32, i32, i32) {
    %c0_i32 = arith.constant 0 : i32
    %c0_i32_0 = arith.constant 0 : i32
    %c0_i32_1 = arith.constant 0 : i32
    %c0_i32_2 = arith.constant 0 : i32
    return %c0_i32, %c0_i32_0, %c0_i32_1 : i32, i32, i32
  }
  func.func @transform_19(%arg0: i32) -> (i32, i32, i32) {
    %c0_i32 = arith.constant 0 : i32
    %c0_i32_0 = arith.constant 0 : i32
    %c0_i32_1 = arith.constant 0 : i32
    %c0_i32_2 = arith.constant 0 : i32
    return %c0_i32, %c0_i32_0, %c0_i32_1 : i32, i32, i32
  }
  func.func @transform_20(%arg0: i32) -> (i32, i32) {
    %c0_i32 = arith.constant 0 : i32
    %c0_i32_0 = arith.constant 0 : i32
    %c0_i32_1 = arith.constant 0 : i32
    return %c0_i32, %c0_i32_0 : i32, i32
  }
  func.func @transform_21(%arg0: i32) -> (i32, i32) {
    %c0_i32 = arith.constant 0 : i32
    %c0_i32_0 = arith.constant 0 : i32
    %c0_i32_1 = arith.constant 0 : i32
    return %c0_i32, %c0_i32_0 : i32, i32
  }
  func.func @transform_22(%arg0: i32) -> (i32, i32) {
    %c0_i32 = arith.constant 0 : i32
    %c0_i32_0 = arith.constant 0 : i32
    %c0_i32_1 = arith.constant 0 : i32
    return %c0_i32, %c0_i32_0 : i32, i32
  }
  func.func @transform_23(%arg0: i32) -> (i32, i32) {
    %c0_i32 = arith.constant 0 : i32
    %c0_i32_0 = arith.constant 0 : i32
    %c0_i32_1 = arith.constant 0 : i32
    return %c0_i32, %c0_i32_0 : i32, i32
  }
  func.func @transform_24(%arg0: i32) -> (i32, i32, i32) {
    %c0_i32 = arith.constant 0 : i32
    %c0_i32_0 = arith.constant 0 : i32
    %c0_i32_1 = arith.constant 0 : i32
    return %arg0, %c0_i32, %c0_i32_0 : i32, i32, i32
  }
}

</mosaic_0001>

<bundles_post_ra>
// kernel: transformer_text_classifier_forward.1
= control target key start
LH: loop header
LB: loop body
LE: loop exit
PB: predicated region body
PF: predicated region fallthrough
CT: control target
= control target key end

     0   :  { %s4209_s0 = inlined_call_operand.vmem [shape: f32[2,8,32], index: 0, kind: input, shape index: {}]   ;;  %s4210_s1 = inlined_call_operand.vmem [shape: f32[2,1,8], index: 1, kind: input, shape index: {}]   ;;  %s4211_s2 = inlined_call_operand.vmem [shape: f32[1,32], index: 2, kind: input, shape index: {}]   ;;  %s4212_s3 = inlined_call_operand.vmem [shape: f32[1,32], index: 3, kind: input, shape index: {}]   ;;  %s4213_s4 = inlined_call_operand.vmem [shape: bf16[2,2,32,16], index: 4, kind: input, shape index: {}]   ;;  %s4214_s5 = inlined_call_operand.vmem [shape: bf16[2,2,32,16], index: 5, kind: input, shape index: {}]   ;;  %s4215_s6 = inlined_call_operand.vmem [shape: bf16[2,2,32,16], index: 6, kind: input, shape index: {}]   ;;  %s4216_s7 = inlined_call_operand.vmem [shape: f32[2,2,1,16], index: 7, kind: input, shape index: {}]   ;;  %s4217_s8 = inlined_call_operand.vmem [shape: f32[2,2,1,16], index: 8, kind: input, shape index: {}]   ;;  %s4218_s9 = inlined_call_operand.vmem [shape: f32[2,2,1,16], index: 9, kind: input, shape index: {}]   ;;  %s4219_s10 = inlined_call_operand.vmem [shape: bf16[2,2,16,32], index: 10, kind: input, shape index: {}]   ;;  %s4220_s11 = inlined_call_operand.vmem [shape: f32[2,1,32], index: 11, kind: input, shape index: {}]   ;;  %s4221_s12 = inlined_call_operand.vmem [shape: f32[2,1,32], index: 12, kind: input, shape index: {}]   ;;  %s4222_s13 = inlined_call_operand.vmem [shape: f32[2,1,32], index: 13, kind: input, shape index: {}]   ;;  %s4223_s14 = inlined_call_operand.vmem [shape: bf16[2,32,64], index: 14, kind: input, shape index: {}]   ;;  %s4224_s15 = inlined_call_operand.vmem [shape: f32[2,1,64], index: 15, kind: input, shape index: {}]   ;;  %s4225_s16 = inlined_call_operand.vmem [shape: bf16[2,64,32], index: 16, kind: input, shape index: {}]   ;;  %s4226_s17 = inlined_call_operand.vmem [shape: f32[2,1,32], index: 17, kind: input, shape index: {}]   ;;  %s4227_s18 = inlined_call_operand.vmem [shape: f32[2,1,32], index: 18, kind: input, shape index: {}]   ;;  %s4228_s19 = inlined_call_operand.vmem [shape: f32[2,1,32], index: 19, kind: input, shape index: {}]   ;;  %s4229_s20 = inlined_call_operand.vmem [shape: bf16[32,32], index: 20, kind: input, shape index: {}]   ;;  %s4230_s21 = inlined_call_operand.vmem [shape: f32[1,32], index: 21, kind: input, shape index: {}]   ;;  %s4231_s22 = inlined_call_operand.vmem [shape: bf16[32,4], index: 22, kind: input, shape index: {}]   ;;  %s4232_s23 = inlined_call_operand.vmem [shape: f32[1,4], index: 23, kind: input, shape index: {}]   ;;  %s4233_s24 = inlined_call_operand.hbm [shape: f32[2,1,4], index: 24, kind: output, shape index: {}]  }
   0x1   :  { %4248 = sst [smem:[#allocation11_spill]] %s4209_s0 }
   0x2   :  { %4249 = sst [smem:[#allocation12_spill]] %s4210_s1 }
   0x3   :  { %4250 = sst [smem:[#allocation13_spill]] %s4211_s2 }
   0x4   :  { %4251 = sst [smem:[#allocation14_spill]] %s4212_s3 }
   0x5   :  { %4252 = sst [smem:[#allocation15_spill]] %s4213_s4 }
   0x6   :  { %4253 = sst [smem:[#allocation16_spill]] %s4214_s5 }
   0x7   :  { %4254 = sst [smem:[#allocation17_spill]] %s4215_s6 }
   0x8   :  { %4255 = sst [smem:[#allocation18_spill]] %s4216_s7 }
   0x9   :  { %4256 = sst [smem:[#allocation19_spill]] %s4217_s8 }
   0xa   :  { %4257 = sst [smem:[#allocation20_spill]] %s4218_s9 }
   0xb   :  { %4258 = sst [smem:[#allocation21_spill]] %s4233_s24 }
   0xc   :  { %29 = vsyncpa [#allocation3], 0 }
   0xd   :  { %31 = vsyncpa [#allocation3 + $0x1], 0  ;;  %s3680_s5 = smov 0   ;;  %s3682_s26 = smov 0  }
   0xe   :  { %s3684_s27 = smov 0   ;;  %s3686_s28 = smov 0  }
   0xf LB: > { %4259 = sst [smem:[#allocation5_spill]] %s3538_s5  ;;  %s3701_s6 = sadd.s32 4294967295, %s3550_s28   ;;  %s3550_s28 = sphi %s3686_s28, %s4283_s28   ;;  %s3546_s27 = sphi %s3684_s27, %s4285_s27   ;;  %s3542_s26 = sphi %s3682_s26, %s4287_s26   ;;  %s3538_s5 = sphi %s3680_s5, %s4286_s5  }
  0x10   : > { %4260 = sst [smem:[#allocation6_spill]] %s3546_s27  ;;  %s2884_s2 = sadd.s32 4294967294, %s3550_s28  }
  0x11   : > { %4261 = sst [smem:[#allocation7_spill]] %s3550_s28  ;;  %s3705_s29 = sadd.s32 1, %s3550_s28  }
  0x12   : > { %4262 = sst [smem:[#allocation8_spill]] %s3705_s29  ;;  %s558_s0 = sadd.s32 1, %s3546_s27 }
  0x13   : > { %s555_s7 = ssub.s32 %s3550_s28, %s3705_s29  ;;  %p568_p0 = scmp.ne.s32.totalorder %s3546_s27, %s3542_s26 }
  0x14   : > { %p556_p1 = scmp.eq.s32.totalorder %s555_s7, 0  ;;  %p569_p2 = scmp.eq.s32.totalorder %s3701_s6, 1 }
  0x15   : > { %p574_p3 = scmp.ne.s32.totalorder %s3542_s26, %s3538_s5  ;;  %p575_p4 = scmp.eq.s32.totalorder %s2884_s2, 1 }
  0x16   : > { %s3716_s30 = scalar_select %p556_p1, %s3546_s27, %s558_s0  }
  0x17   : > { %p3718_p5 = por %p569_p2, %p568_p0  ;;  %p3722_p6 = por %p575_p4, %p574_p3 }
  0x18   : > { %4263 = sst [smem:[#allocation9_spill]] %s3716_s30  ;;  %p2887_p7 = scmp.ge.s32.totalorder %s3550_s28, 1 }
  0x19   : > { %s4265_s25 = scalar_select %p3722_p6, 1, 0 }
  0x1a   : > { %p672_p8 = scmp.lt.s32.totalorder %s3550_s28, 3 }
  0x1b   : > { %4266 = sst [smem:[#allocation10_spill]] %s4265_s25 }
  0x1c   : > { %p673_p9 = pnand %p2887_p7, %p672_p8 }
  0x1d   : > { %p739_p10 = scmp.lt.s32.totalorder (!%p673_p9), %s3701_s6, 1  ;;  %vm757_vm0 = vcmask (!%p673_p9), 261120   ;;  %s4267_s0 = sld [smem:[#allocation11_spill]] (!%p673_p9)  ;;  %v3552_v9 = vmov (!%p673_p9), 0.0   ;;  %vm3553_vm1 = vmmov (!%p673_p9), 0   ;;  %vm981_vm2 = vcmask (!%p673_p9), 130048  }
  0x1e   : > { %676 = sbr.rel (%p673_p9) target bundleno = 6898 (0x1af2), region = 116  ;;  %s4268_s29 = sld [smem:[#allocation15_spill]] (!%p673_p9)  ;;  %3147 = vmatprep.subr.bf16.mxu0 (!%p673_p9), %v3552_v9  ;;  %3155 = vmatprep.subr.bf16.mxu1 (!%p673_p9), %v3552_v9  ;;  %vm1047_vm3 = vcmask (!%p673_p9), 1043456   ;;  %vm1030_vm4 = vcmask (!%p673_p9), 64512   ;;  %vm1654_vm5 = vcmask (!%p673_p9), 523264   ;;  %vm2805_vm6 = vcmask (!%p673_p9), 24576  }
  0x1f   : > { %s4269_s28 = sld [smem:[#allocation16_spill]] (!%p673_p9)  ;;  %3151 = vmatprep.mubr.msk.bf16.mxu0 (!%p673_p9), %vm3553_vm1, %v3552_v9  ;;  %3159 = vmatprep.mubr.msk.bf16.mxu1 (!%p673_p9), %vm3553_vm1, %v3552_v9  ;;  %s4271_s25 = sld [smem:[#allocation13_spill]] (!%p673_p9) }
  0x20   : > { %s4273_s27 = sld [smem:[#allocation17_spill]] (!%p673_p9)  ;;  %s4276_s1 = sld [smem:[#allocation18_spill]] (!%p673_p9) }
  0x21   : > { %s4277_s9 = sld [smem:[#allocation20_spill]] (!%p673_p9) }
  0x24   : > { %v3412_v7 = vld [vmem:[%s4268_s29] sm:$0xff] (!%p673_p9)   ;;  %v3414_v10 = vld [vmem:[%s4268_s29 + $0x8] sm:$0xff] (!%p673_p9)   ;;  %v3418_v43 = vld [vmem:[%s4268_s29 + $0x10] sm:$0xff] (!%p673_p9)  }
  0x25   : > { %s3730_s8 = scalar_select %p739_p10, %s3701_s6, 1  ;;  %v3413_v8 = vld [vmem:[%s4269_s28] sm:$0xff]   ;;  %3148 = vmatpush3.bf16.msra.mxu0 %v3412_v7  ;;  %v3419_v48 = vld [vmem:[%s4268_s29 + $0x18] sm:$0xff]  }
  0x26   : > { %s4270_s24 = smov %s4269_s28  ;;  %3156 = vmatpush3.bf16.msra.mxu1 %v3413_v8  ;;  %3149 = vmatprep.subr.bf16.mxu0 %v3552_v9  ;;  %v2890_v16 = vld [vmem:[%s4271_s25] ss:$0 sm:$0xff]  ;;  %s4274_s30 = smov %s4273_s27 }
  0x27   : > { %s2888_s4 = sshll.u32 %s3730_s8, 3  ;;  %3157 = vmatprep.subr.bf16.mxu1 %v3552_v9  ;;  %v3415_v11 = vld [vmem:[%s4270_s24 + $0x8] sm:$0xff]   ;;  %v3416_v21 = vld [vmem:[%s4273_s27] sm:$0xff]   ;;  %v3420_v49 = vld [vmem:[%s4274_s30 + $0x10] sm:$0xff]   ;;  %s737_s25 = sand.u32 1, %s3542_s26  }
  0x28   : > { %s742_s7 = scalar_lea.vmem %s4267_s0, %s2888_s4  ;;  %v3417_v23 = vld [vmem:[%s4274_s30 + $0x8] sm:$0xff]   ;;  %s4275_s0 = sld [smem:[#allocation19_spill]]  ;;  %v2892_v35 = vld [vmem:[%s4276_s1] ss:$0 sm:$0xff]  ;;  %v3421_v50 = vld [vmem:[%s4274_s30 + $0x18] sm:$0xff]  }
  0x29   : > { %v754_v0 = vld [vmem:[%s742_s7] sm:$0xff]  ;;  %3150 = vmatpush3.bf16.msra.mxu0 %v3414_v10  ;;  %s4272_s7 = sld [smem:[#allocation14_spill]]  ;;  %s738_s27 = scalar_lea.vmem [#allocation2], %s737_s25 }
  0x2a   : > { %v758_v1 = vsel %vm757_vm0, %v754_v0, 0.0  ;;  %3158 = vmatpush3.bf16.msra.mxu1 %v3415_v11  ;;  %3163 = vmatprep.subr.bf16.mxu0 %v3552_v9  ;;  %v2900_v37 = vld [vmem:[%s4277_s9] ss:$0 sm:$0xff]  ;;  %v2929_v63 = vld [vmem:[%s4277_s9 + $0x1] ss:$0 sm:$0xff]  ;;  %s2820_s5 = sshll.u32 %s738_s27, 4  ;;  %s4169_s5 = int_to_ptr.vmem [resolvable:$true] %s2820_s5 }
  0x2b   : > { %759 = vadd.xlane.f32.xlu0 %v758_v1  ;;  %3171 = vmatprep.subr.bf16.mxu1 %v3552_v9  ;;  %s3488_s2 = scalar_lea.vmem %s4169_s5, 16 }
  0x2c   : > { %p3489_p11 = scmp.ne.s32.totalorder %s4169_s5, %s3488_s2 }
  0x2e   : > { %v2896_v24 = vld [vmem:[%s4275_s0] ss:$0 sm:$0xff]  ;;  %p3490_p12 = pnand %p3489_p11, %p3718_p5 }
  0x2f   : > { %v2891_v18 = vld [vmem:[%s4272_s7] ss:$0 sm:$0xff]  ;;  %s4278_s7 = sld [smem:[#allocation12_spill]] }
  0x30   : > { %p3491_p13 = pneg %p3490_p12 }
  0x35   : > { %s745_s4 = scalar_lea.vmem %s4278_s7, %s3730_s8  ;;  %s3554_s7 = smov [#allocation2]  }
  0x36   : > { %v3836_v51 = vld [vmem:[%s745_s4] ss:$0 sm:$0xff]  ;;  %s3062_s4 = sshll.u32 %s3701_s6, 4  ;;  %s2808_s6 = scalar_lea.sflag [#allocation3], %s737_s25 }
  0xb8   : > { %v760_v2 = vpop.xlane.xlu0 %759 }
  0xb9   : > { %v762_v3 = vmul.f32 0.03125, %v760_v2 }
  0xbb   : > { %v763_v4 = vsub.f32 %v754_v0, %v762_v3 }
  0xbd   : > { %v764_v5 = vmul.f32 %v763_v4, %v763_v4 }
  0xbf   : > { %v765_v6 = vsel %vm757_vm0, %v764_v5, 0.0 }
  0xc0   : > { %766 = vadd.xlane.f32.xlu0 %v765_v6 }
 0x14d   : > { %v767_v12 = vpop.xlane.xlu0 %766 }
 0x14e   : > { %v768_v13 = vmul.f32 0.03125, %v767_v12 }
 0x150   : > { %v769_v14 = vadd.f32 1e-12, %v768_v13 }
 0x152   : > { %3456 = vrsqrt.f32 %v769_v14 }
 0x15c   : > { %v3457_v15 = vpop.eup %3456 }
 0x15d   : > { %v771_v17 = vmul.f32 %v3457_v15, %v763_v4 }
 0x15f   : > { %v778_v19 = vmul.f32 %v2890_v16, %v771_v17  ;;  %v3422_v16 = vld [vmem:[%s4270_s24 + $0x10] sm:$0xff]  }
 0x161   : > { %v3766_v20 = vadd.f32 %v2891_v18, %v778_v19  ;;  %v3423_v18 = vld [vmem:[%s4270_s24 + $0x18] sm:$0xff]  }
 0x163   : > { %v3773_v22 = vpack.c.bf16 %v3766_v20, %v3766_v20 }
 0x165   : > { %3152 = vmatmul.mubr.msk.bf16.vlgmr.msra.gmra.mrb[0].mxu0 %vm757_vm0, %v3773_v22  ;;  %3160 = vmatmul.mubr.msk.bf16.vlgmr.msra.gmra.mrb[0].mxu1 %vm757_vm0, %v3773_v22 }
 0x166   : > { %3164 = vmatpush3.bf16.msra.mxu0 %v3416_v21  ;;  %3167 = vmatprep.mubr.msk.bf16.mxu0 %vm3553_vm1, %v3552_v9 }
 0x167   : > { %3165 = vmatprep.subr.bf16.mxu0 %v3552_v9  ;;  %3173 = vmatprep.mubr.msk.bf16.mxu1 %vm3553_vm1, %v3552_v9 }
 0x16a   : > { %3166 = vmatpush3.bf16.msra.mxu0 %v3417_v23 }
 0x16b   : > { %3177 = vmatprep.subr.bf16.mxu0 %v3552_v9 }
 0x16d   : > { %3168 = vmatmul.mubr.msk.bf16.vlgmr.msra.gmra.mrb[4].mxu0 %vm757_vm0, %v3773_v22 }
 0x16e   : > { %3179 = vmatprep.mubr.msk.bf16.mxu0 %vm3553_vm1, %v3552_v9 }
 0x238   : > { %v847_v25 = vpop.f32.mrb[0].mxu0  ;;  %v910_v26 = vpop.f32.mrb[0].mxu1 }
 0x239   : > { %v911_v27 = vadd.f32 %v2896_v24, %v910_v26  ;;  %v3153_v28 = vpop.f32.mrb[1].mxu0  ;;  %v3161_v29 = vpop.f32.mrb[1].mxu1  ;;  %v848_v38 = vadd.f32 %v2892_v35, %v847_v25  ;;  %v2920_v25 = vld [vmem:[%s4275_s0 + $0x1] ss:$0 sm:$0xff] }
 0x23a   : > { %v850_v30 = vpop.f32.mrb[2].mxu0  ;;  %v913_v31 = vpop.f32.mrb[2].mxu1 }
 0x23b   : > { %v980_v32 = vpack.c.bf16 %v911_v27, %v911_v27  ;;  %v3154_v33 = vpop.f32.mrb[3].mxu0  ;;  %v3162_v34 = vpop.f32.mrb[3].mxu1  ;;  %v979_v44 = vpack.c.bf16 %v848_v38, %v848_v38 }
 0x23d   : > { %v986_v36 = vsel %vm981_vm2, %v980_v32, 0 }
 0x23e   : > { %3172 = vmatpush3.bf16.xpose.msra.mxu1 %v986_v36 }
 0x23f   : > { %3183 = vmatprep.subr.bf16.mxu1 %v3552_v9 }
 0x240   : > { %v973_v39 = vpop.f32.mrb[4].mxu0 }
 0x241   : > { %v974_v40 = vadd.f32 %v2900_v37, %v973_v39  ;;  %v3169_v41 = vpop.f32.mrb[5].mxu0 }
 0x242   : > { %v976_v42 = vpop.f32.mrb[6].mxu0 }
 0x243   : > { %v1043_v45 = vpack.c.bf16 %v974_v40, %v974_v40  ;;  %v3170_v46 = vpop.f32.mrb[7].mxu0 }
 0x245   : > { %v1049_v47 = vsel %vm1047_vm3, %v1043_v45, 0  ;;  %3174 = vmatmul.mubr.msk.bf16.vlgmr.msra.gmra.mrb[4].mxu1 %vm981_vm2, %v979_v44 }
 0x246   : > { %3178 = vmatpush3.bf16.msra.mxu0 %v1049_v47  ;;  %3184 = vmatpush3.bf16.msra.mxu1 %v3418_v43  ;;  %v3425_v47 = vld [vmem:[%s4219_s10 + $0x8] sm:$0xff]  }
 0x247   : > { %3185 = vmatprep.subr.bf16.mxu1 %v3552_v9  ;;  %3187 = vmatprep.mubr.msk.bf16.mxu1 %vm3553_vm1, %v3552_v9 }
 0x248   : > { %3191 = vmatprep.subr.bf16.mxu0 %v3552_v9 }
 0x24a   : > { %3186 = vmatpush3.bf16.msra.mxu1 %v3419_v48 }
 0x24b   : > { %3199 = vmatprep.subr.bf16.mxu1 %v3552_v9 }
 0x24d   : > { %3188 = vmatmul.mubr.msk.bf16.vlgmr.msra.gmra.mrb[8].mxu1 %vm757_vm0, %v3773_v22 }
 0x24e   : > { %3200 = vmatpush3.bf16.msra.mxu1 %v3420_v49  ;;  %3203 = vmatprep.mubr.msk.bf16.mxu1 %vm3553_vm1, %v3552_v9 }
 0x24f   : > { %3201 = vmatprep.subr.bf16.mxu1 %v3552_v9 }
 0x252   : > { %3202 = vmatpush3.bf16.msra.mxu1 %v3421_v50 }
 0x253   : > { %3213 = vmatprep.subr.bf16.mxu1 %v3552_v9 }
 0x255   : > { %3204 = vmatmul.mubr.msk.bf16.vlgmr.msra.gmra.mrb[12].mxu1 %vm757_vm0, %v3773_v22 }
 0x256   : > { %3215 = vmatprep.mubr.msk.bf16.mxu1 %vm3553_vm1, %v3552_v9 }
 0x318   : > { %v1022_v52 = vpop.f32.mrb[4].mxu1 }
 0x319   : > { %v1028_v53 = vmul.f32 0.25, %v1022_v52  ;;  %v3175_v54 = vpop.f32.mrb[5].mxu1  ;;  %v3424_v52 = vld [vmem:[%s4219_s10] sm:$0xff]  }
 0x31a   : > { %v1025_v55 = vpop.f32.mrb[6].mxu1 }
 0x31b   : > { %v3176_v56 = vpop.f32.mrb[7].mxu1  ;;  %v1029_v57 = vadd.f32 %v3836_v51, %v1028_v53 }
 0x31d   : > { %v1031_v58 = vsel %vm1030_vm4, %v1029_v57, -inf }
 0x31e   : > { %1032 = vmax.xlane.f32.xlu1 %v1031_v58 }
 0x320   : > { %v1153_v59 = vpop.f32.mrb[8].mxu1 }
 0x321   : > { %v3189_v60 = vpop.f32.mrb[9].mxu1 }
 0x322   : > { %v1156_v61 = vpop.f32.mrb[10].mxu1 }
 0x323   : > { %v3190_v62 = vpop.f32.mrb[11].mxu1 }
 0x328   : > { %v1283_v0 = vpop.f32.mrb[12].mxu1 }
 0x329   : > { %v1284_v1 = vadd.f32 %v2929_v63, %v1283_v0  ;;  %v3205_v2 = vpop.f32.mrb[13].mxu1 }
 0x32a   : > { %v1286_v3 = vpop.f32.mrb[14].mxu1 }
 0x32b   : > { %v1351_v4 = vpack.c.bf16 %v1284_v1, %v1284_v1  ;;  %v3206_v5 = vpop.f32.mrb[15].mxu1  ;;  %v2941_v1 = vld [vmem:[%s4220_s11] ss:$0 sm:$0xff] }
 0x32d   : > { %v1356_v6 = vsel %vm1047_vm3, %v1351_v4, 0 }
 0x32e   : > { %3214 = vmatpush3.bf16.msra.mxu1 %v1356_v6 }
 0x32f   : > { %3225 = vmatprep.subr.bf16.mxu1 %v3552_v9 }
 0x3ab   : > { %v1033_v7 = vpop.xlane.xlu1 %1032 }
 0x3ac   : > { %v1034_v8 = vsub.f32 %v1029_v57, %v1033_v7 }
 0x3ae   : > { %v1035_v10 = vmul.f32 1.442695, %v1034_v8 }
 0x3b0   : > { %3458 = vpow2.f32 %v1035_v10 }
 0x3ba   : > { %v3459_v11 = vpop.eup %3458 }
 0x3bb   : > { %v1037_v12 = vsel %vm1030_vm4, %v3459_v11, 0.0 }
 0x3bc   : > { %1038 = vadd.xlane.f32.xlu1 %v1037_v12 }
 0x449   : > { %v1039_v13 = vpop.xlane.xlu1 %1038 }
 0x44a   : > { %3460 = vrcp.f32 %v1039_v13 }
 0x454   : > { %v3461_v14 = vpop.eup %3460 }
 0x455   : > { %v1041_v15 = vmul.f32 %v3461_v14, %v3459_v11 }
 0x457   : > { %v1042_v17 = vpack.c.bf16 %v1041_v15, %v1041_v15  ;;  %v3426_v15 = vld [vmem:[%s4223_s14] sm:$0xff]  }
 0x459   : > { %3180 = vmatmul.mubr.msk.bf16.vlgmr.msra.gmra.mrb[8].mxu0 %vm1030_vm4, %v1042_v17 }
 0x45a   : > { %3192 = vmatpush3.bf16.msra.mxu0 %v3422_v16  ;;  %3195 = vmatprep.mubr.msk.bf16.mxu0 %vm3553_vm1, %v3552_v9 }
 0x45b   : > { %3193 = vmatprep.subr.bf16.mxu0 %v3552_v9 }
 0x45e   : > { %3194 = vmatpush3.bf16.msra.mxu0 %v3423_v18 }
 0x45f   : > { %3207 = vmatprep.subr.bf16.mxu0 %v3552_v9 }
 0x461   : > { %3196 = vmatmul.mubr.msk.bf16.vlgmr.msra.gmra.mrb[12].mxu0 %vm757_vm0, %v3773_v22  ;;  %v2911_v22 = vld [vmem:[%s4276_s1 + $0x1] ss:$0 sm:$0xff] }
 0x462   : > { %3209 = vmatprep.mubr.msk.bf16.mxu0 %vm3553_vm1, %v3552_v9  ;;  %v1154_v33 = vadd.f32 %v2911_v22, %v1153_v59  ;;  %v2944_v22 = vld [vmem:[%s4224_s15] ss:$0 sm:$0xff] }
 0x464   : > { %v1289_v34 = vpack.c.bf16 %v1154_v33, %v1154_v33 }
 0x52c   : > { %v1085_v19 = vpop.f32.mrb[8].mxu0 }
 0x52d   : > { %v3181_v21 = vpop.f32.mrb[9].mxu0  ;;  %v1091_v54 = vpack.c.bf16 %v1085_v19, %v1085_v19 }
 0x52e   : > { %v1088_v23 = vpop.f32.mrb[10].mxu0  ;;  %v2942_v21 = vld [vmem:[%s4221_s12] ss:$0 sm:$0xff] }
 0x52f   : > { %v3182_v24 = vpop.f32.mrb[11].mxu0 }
 0x530   : > { %v2943_v24 = vld [vmem:[%s4222_s13] ss:$0 sm:$0xff] }
 0x534   : > { %v1218_v26 = vpop.f32.mrb[12].mxu0 }
 0x535   : > { %v1219_v27 = vadd.f32 %v2920_v25, %v1218_v26  ;;  %v3197_v28 = vpop.f32.mrb[13].mxu0 }
 0x536   : > { %v1221_v29 = vpop.f32.mrb[14].mxu0  ;;  %v3428_v28 = vld [vmem:[%s4225_s16] sm:$0xff]  }
 0x537   : > { %v1290_v30 = vpack.c.bf16 %v1219_v27, %v1219_v27  ;;  %v3198_v31 = vpop.f32.mrb[15].mxu0  ;;  %v3429_v29 = vld [vmem:[%s4225_s16 + $0x8] sm:$0xff]  }
 0x538   : > { %v3431_v31 = vld [vmem:[%s4225_s16 + $0x18] sm:$0xff]  }
 0x539   : > { %v1295_v32 = vsel %vm981_vm2, %v1290_v30, 0  ;;  %v3430_v30 = vld [vmem:[%s4225_s16 + $0x10] sm:$0xff]  }
 0x53a   : > { %3208 = vmatpush3.bf16.xpose.msra.mxu0 %v1295_v32 }
 0x53b   : > { %3219 = vmatprep.subr.bf16.mxu0 %v3552_v9 }
 0x541   : > { %3210 = vmatmul.mubr.msk.bf16.vlgmr.msra.gmra.mrb[16].mxu0 %vm981_vm2, %v1289_v34 }
 0x542   : > { %3221 = vmatprep.mubr.msk.bf16.mxu0 %vm3553_vm1, %v3552_v9  ;;  %3220 = vmatpush3.bf16.msra.mxu0 %v3425_v47  ;;  %v2948_v47 = vld [vmem:[%s4226_s17] ss:$0 sm:$0xff] }
 0x543   : > { %3231 = vmatprep.subr.bf16.mxu0 %v3552_v9 }
 0x614   : > { %v1331_v35 = vpop.f32.mrb[16].mxu0 }
 0x615   : > { %v1337_v36 = vmul.f32 0.25, %v1331_v35  ;;  %v3211_v37 = vpop.f32.mrb[17].mxu0 }
 0x616   : > { %v1334_v38 = vpop.f32.mrb[18].mxu0 }
 0x617   : > { %v3212_v39 = vpop.f32.mrb[19].mxu0  ;;  %v1338_v40 = vadd.f32 %v3836_v51, %v1337_v36 }
 0x619   : > { %v1339_v41 = vsel %vm1030_vm4, %v1338_v40, -inf }
 0x61a   : > { %1340 = vmax.xlane.f32.xlu0 %v1339_v41 }
 0x6a7   : > { %v1341_v42 = vpop.xlane.xlu0 %1340 }
 0x6a8   : > { %v1342_v43 = vsub.f32 %v1338_v40, %v1341_v42 }
 0x6aa   : > { %v1343_v44 = vmul.f32 1.442695, %v1342_v43 }
 0x6ac   : > { %3462 = vpow2.f32 %v1343_v44 }
 0x6b6   : > { %v3463_v45 = vpop.eup %3462 }
 0x6b7   : > { %v1345_v46 = vsel %vm1030_vm4, %v3463_v45, 0.0 }
 0x6b8   : > { %1346 = vadd.xlane.f32.xlu1 %v1345_v46 }
 0x745   : > { %v1347_v48 = vpop.xlane.xlu1 %1346 }
 0x746   : > { %3464 = vrcp.f32 %v1347_v48 }
 0x750   : > { %v3465_v49 = vpop.eup %3464 }
 0x751   : > { %v1349_v50 = vmul.f32 %v3465_v49, %v3463_v45 }
 0x753   : > { %v1350_v53 = vpack.c.bf16 %v1349_v50, %v1349_v50 }
 0x755   : > { %3216 = vmatmul.mubr.msk.bf16.vlgmr.msra.gmra.mrb[16].mxu1 %vm1030_vm4, %v1350_v53 }
 0x756   : > { %3226 = vmatpush3.bf16.msra.mxu1 %v3424_v52  ;;  %3227 = vmatprep.mubr.msk.bf16.mxu1 %vm3553_vm1, %v3552_v9 }
 0x757   : > { %3239 = vmatprep.subr.bf16.mxu1 %v3552_v9 }
 0x75d   : > { %3228 = vmatmul.mubr.msk.bf16.vlgmr.msra.gmra.mrb[20].mxu1 %vm981_vm2, %v1091_v54 }
 0x75e   : > { %3247 = vmatprep.mubr.msk.bf16.mxu1 %vm3553_vm1, %v3552_v9  ;;  %3240 = vmatpush3.bf16.msra.mxu1 %v3428_v28 }
 0x75f   : > { %3241 = vmatprep.subr.bf16.mxu1 %v3552_v9 }
 0x762   : > { %3242 = vmatpush3.bf16.msra.mxu1 %v3429_v29 }
 0x763   : > { %3243 = vmatprep.subr.bf16.mxu1 %v3552_v9 }
 0x766   : > { %3244 = vmatpush3.bf16.msra.mxu1 %v3430_v30 }
 0x767   : > { %3245 = vmatprep.subr.bf16.mxu1 %v3552_v9 }
 0x76a   : > { %3246 = vmatpush3.bf16.msra.mxu1 %v3431_v31 }
 0x76b   : > { %3267 = vmatprep.subr.bf16.mxu1 %v3552_v9 }
 0x828   : > { %v1392_v55 = vpop.f32.mrb[16].mxu1 }
 0x829   : > { %v1398_v56 = vpack.c.bf16 %v1392_v55, %v1392_v55  ;;  %v3217_v57 = vpop.f32.mrb[17].mxu1 }
 0x82a   : > { %v1395_v58 = vpop.f32.mrb[18].mxu1 }
 0x82b   : > { %v3218_v59 = vpop.f32.mrb[19].mxu1  ;;  %3222 = vmatmul.mubr.msk.bf16.vlgmr.msra.gmra.mrb[20].mxu0 %vm981_vm2, %v1398_v56 }
 0x82c   : > { %3235 = vmatprep.mubr.msk.bf16.mxu0 %vm3553_vm1, %v3552_v9  ;;  %3232 = vmatpush3.bf16.msra.mxu0 %v3426_v15 }
 0x82d   : > { %3233 = vmatprep.subr.bf16.mxu0 %v3552_v9 }
 0x830   : > { %v1494_v60 = vpop.f32.mrb[20].mxu1 }
 0x831   : > { %v3229_v61 = vpop.f32.mrb[21].mxu1 }
 0x832   : > { %v1497_v62 = vpop.f32.mrb[22].mxu1  ;;  %v3432_v61 = vld [vmem:[%s4268_s29 + $0x20] sm:$0xff]  }
 0x833   : > { %v3230_v63 = vpop.f32.mrb[23].mxu1  ;;  %v3433_v62 = vld [vmem:[%s4274_s30 + $0x20] sm:$0xff]  }
 0x834   : > { %v3434_v63 = vld [vmem:[%s4268_s29 + $0x28] sm:$0xff]  }
 0x8fe   : > { %v1445_v0 = vpop.f32.mrb[20].mxu0 }
 0x8ff   : > { %v1495_v2 = vadd.f32 %v1494_v60, %v1445_v0  ;;  %v3223_v3 = vpop.f32.mrb[21].mxu0  ;;  %v3435_v0 = vld [vmem:[%s4274_s30 + $0x28] sm:$0xff]  }
 0x900   : > { %v1448_v4 = vpop.f32.mrb[22].mxu0 }
 0x901   : > { %v1507_v5 = vadd.f32 %v2941_v1, %v1495_v2  ;;  %v3224_v6 = vpop.f32.mrb[23].mxu0 }
 0x903   : > { %v1508_v7 = vadd.f32 %v1507_v5, %v3766_v20  ;;  %v3427_v20 = vld [vmem:[%s4223_s14 + $0x8] sm:$0xff]   ;;  %v2954_v5 = vld [vmem:[%s4227_s18] ss:$0 sm:$0xff] }
 0x904   : > { %3234 = vmatpush3.bf16.msra.mxu0 %v3427_v20 }
 0x905   : > { %v1511_v8 = vsel %vm757_vm0, %v1508_v7, 0.0  ;;  %3251 = vmatprep.subr.bf16.mxu0 %v3552_v9 }
 0x906   : > { %1512 = vadd.xlane.f32.xlu0 %v1511_v8 }
 0x993   : > { %v1513_v10 = vpop.xlane.xlu0 %1512 }
 0x994   : > { %v1514_v11 = vmul.f32 0.03125, %v1513_v10 }
 0x996   : > { %v1515_v12 = vsub.f32 %v1508_v7, %v1514_v11  ;;  %v2955_v7 = vld [vmem:[%s4228_s19] ss:$0 sm:$0xff] }
 0x997   : > { %v3436_v11 = vld [vmem:[%s4270_s24 + $0x20] sm:$0xff]  }
 0x998   : > { %v1516_v13 = vmul.f32 %v1515_v12, %v1515_v12 }
 0x99a   : > { %v1517_v14 = vsel %vm757_vm0, %v1516_v13, 0.0  ;;  %v3437_v13 = vld [vmem:[%s4270_s24 + $0x28] sm:$0xff]  }
 0x99b   : > { %1518 = vadd.xlane.f32.xlu1 %v1517_v14  ;;  %v2979_v14 = vld [vmem:[%s4277_s9 + $0x2] ss:$0 sm:$0xff] }
 0xa28   : > { %v1519_v16 = vpop.xlane.xlu1 %1518 }
 0xa29   : > { %v1520_v17 = vmul.f32 0.03125, %v1519_v16 }
 0xa2b   : > { %v1521_v18 = vadd.f32 1e-12, %v1520_v17 }
 0xa2d   : > { %3466 = vrsqrt.f32 %v1521_v18 }
 0xa37   : > { %v3467_v19 = vpop.eup %3466 }
 0xa38   : > { %v1523_v23 = vmul.f32 %v3467_v19, %v1515_v12 }
 0xa3a   : > { %v1530_v25 = vmul.f32 %v2942_v21, %v1523_v23 }
 0xa3c   : > { %v1537_v26 = vadd.f32 %v2943_v24, %v1530_v25 }
 0xa3e   : > { %v1538_v27 = vpack.c.bf16 %v1537_v26, %v1537_v26 }
 0xa40   : > { %3236 = vmatmul.mubr.msk.bf16.vlgmr.msra.gmra.mrb[24].mxu0 %vm757_vm0, %v1538_v27  ;;  %v2970_v27 = vld [vmem:[%s4275_s0 + $0x2] ss:$0 sm:$0xff] }
 0xa41   : > { %3255 = vmatprep.mubr.msk.bf16.mxu0 %vm3553_vm1, %v3552_v9  ;;  %3252 = vmatpush3.bf16.msra.mxu0 %v3432_v61 }
 0xa42   : > { %3253 = vmatprep.subr.bf16.mxu0 %v3552_v9 }
 0xa45   : > { %3254 = vmatpush3.bf16.msra.mxu0 %v3434_v63 }
 0xa46   : > { %3259 = vmatprep.subr.bf16.mxu0 %v3552_v9 }
 0xb13   : > { %v1599_v32 = vpop.f32.mrb[24].mxu0 }
 0xb14   : > { %v1600_v33 = vadd.f32 %v2944_v22, %v1599_v32  ;;  %v3237_v34 = vpop.f32.mrb[25].mxu0 }
 0xb15   : > { %v1602_v35 = vpop.f32.mrb[26].mxu0 }
 0xb16   : > { %v1606_v36 = vmul.f32 0.044715, %v1600_v33  ;;  %v3238_v37 = vpop.f32.mrb[27].mxu0  ;;  %v1605_v43 = vmul.f32 0.5, %v1600_v33 }
 0xb18   : > { %v1607_v38 = vmul.f32 %v1606_v36, %v1600_v33  ;;  %v3438_v36 = vld [vmem:[%s4268_s29 + $0x30] sm:$0xff]  }
 0xb1a   : > { %v1608_v39 = vmul.f32 %v1607_v38, %v1600_v33  ;;  %v3439_v38 = vld [vmem:[%s4268_s29 + $0x38] sm:$0xff]  }
 0xb1c   : > { %v1609_v40 = vadd.f32 %v1608_v39, %v1600_v33  ;;  %v2961_v33 = vld [vmem:[%s4276_s1 + $0x2] ss:$0 sm:$0xff]  ;;  %v3440_v39 = vld [vmem:[%s4274_s30 + $0x30] sm:$0xff]  }
 0xb1e   : > { %v1610_v41 = vmul.f32 0.7978846, %v1609_v40  ;;  %v3441_v40 = vld [vmem:[%s4274_s30 + $0x38] sm:$0xff]  }
 0xb20   : > { %3468 = vtanh.f32 %v1610_v41 }
 0xb2a   : > { %v3469_v42 = vpop.eup %3468 }
 0xb2b   : > { %v1612_v44 = vadd.f32 1.0, %v3469_v42 }
 0xb2d   : > { %v1613_v45 = vmul.f32 %v1612_v44, %v1605_v43 }
 0xb2f   : > { %v1614_v46 = vpack.c.bf16 %v1613_v45, %v1613_v45 }
 0xb31   : > { %3248 = vmatmul.mubr.msk.bf16.vlgmr.msra.gmra.mrb[24].mxu1 %vm1654_vm5, %v1614_v46 }
 0xb32   : > { %3271 = vmatprep.mubr.msk.bf16.mxu1 %vm3553_vm1, %v3552_v9  ;;  %3268 = vmatpush3.bf16.msra.mxu1 %v3433_v62 }
 0xb33   : > { %3269 = vmatprep.subr.bf16.mxu1 %v3552_v9 }
 0xb36   : > { %3270 = vmatpush3.bf16.msra.mxu1 %v3435_v0 }
 0xb37   : > { %3281 = vmatprep.subr.bf16.mxu1 %v3552_v9 }
 0xc04   : > { %v1692_v48 = vpop.f32.mrb[24].mxu1 }
 0xc05   : > { %v1693_v49 = vadd.f32 %v2948_v47, %v1692_v48  ;;  %v3249_v50 = vpop.f32.mrb[25].mxu1 }
 0xc06   : > { %v1695_v52 = vpop.f32.mrb[26].mxu1 }
 0xc07   : > { %v3250_v53 = vpop.f32.mrb[27].mxu1  ;;  %v1698_v54 = vadd.f32 %v1693_v49, %v1537_v26 }
 0xc08   : > { %v3010_v53 = vld [vmem:[%s4277_s9 + $0x3] ss:$0 sm:$0xff]  ;;  %s3492_s9 = sshll.u32 %s3554_s7, 4  ;;  %s3493_s9 = int_to_ptr.vmem [resolvable:$false] %s3492_s9 }
 0xc09   : > { %v1701_v55 = vsel %vm757_vm0, %v1698_v54, 0.0  ;;  %s3494_s8 = scalar_lea.vmem %s3493_s9, 32  ;;  %p3495_p0 = scmp.lt.s32.totalorder %s4169_s5, %s3493_s9 }
 0xc0a   : > { %1702 = vadd.xlane.f32.xlu0 %v1701_v55  ;;  %p3496_p1 = scmp.lt.s32.totalorder %s3494_s8, %s3488_s2 }
 0xc0c   : > { %p3497_p2 = por %p3496_p1, %p3495_p0 }
 0xc0e   : > { %p3498_p3 = pnand %p3497_p2, %p3491_p13 }
 0xc97   : > { %v1703_v56 = vpop.xlane.xlu0 %1702 }
 0xc98   : > { %v1704_v57 = vmul.f32 0.03125, %v1703_v56 }
 0xc9a   : > { %v1705_v58 = vsub.f32 %v1698_v54, %v1704_v57 }
 0xc9c   : > { %v1706_v59 = vmul.f32 %v1705_v58, %v1705_v58 }
 0xc9e   : > { %v1707_v60 = vsel %vm757_vm0, %v1706_v59, 0.0 }
 0xc9f   : > { %1708 = vadd.xlane.f32.xlu1 %v1707_v60 }
 0xd2c   : > { %v1709_v1 = vpop.xlane.xlu1 %1708 }
 0xd2d   : > { %v1710_v2 = vmul.f32 0.03125, %v1709_v1 }
 0xd2f   : > { %v1711_v3 = vadd.f32 1e-12, %v1710_v2 }
 0xd31   : > { %3470 = vrsqrt.f32 %v1711_v3 }
 0xd3b   : > { %v3471_v4 = vpop.eup %3470 }
 0xd3c   : > { %v1713_v6 = vmul.f32 %v3471_v4, %v1705_v58 }
 0xd3e   : > { %v1720_v8 = vmul.f32 %v2954_v5, %v1713_v6  ;;  %v3442_v5 = vld [vmem:[%s4270_s24 + $0x30] sm:$0xff]  }
 0xd40   : > { %v3964_v10 = vadd.f32 %v2955_v7, %v1720_v8  ;;  %v3443_v7 = vld [vmem:[%s4270_s24 + $0x38] sm:$0xff]  }
 0xd42   : > { %v3971_v12 = vpack.c.bf16 %v3964_v10, %v3964_v10 }
 0xd44   : > { %3256 = vmatmul.mubr.msk.bf16.vlgmr.msra.gmra.mrb[28].mxu0 %vm757_vm0, %v3971_v12  ;;  %3272 = vmatmul.mubr.msk.bf16.vlgmr.msra.gmra.mrb[28].mxu1 %vm757_vm0, %v3971_v12 }
 0xd45   : > { %3260 = vmatpush3.bf16.msra.mxu0 %v3436_v11  ;;  %3263 = vmatprep.mubr.msk.bf16.mxu0 %vm3553_vm1, %v3552_v9 }
 0xd46   : > { %3261 = vmatprep.subr.bf16.mxu0 %v3552_v9  ;;  %3283 = vmatprep.mubr.msk.bf16.mxu1 %vm3553_vm1, %v3552_v9 }
 0xd49   : > { %3262 = vmatpush3.bf16.msra.mxu0 %v3437_v13 }
 0xd4a   : > { %3275 = vmatprep.subr.bf16.mxu0 %v3552_v9 }
 0xd4c   : > { %3264 = vmatmul.mubr.msk.bf16.vlgmr.msra.gmra.mrb[32].mxu0 %vm757_vm0, %v3971_v12 }
 0xd4d   : > { %3277 = vmatprep.mubr.msk.bf16.mxu0 %vm3553_vm1, %v3552_v9 }
 0xe17   : > { %v1791_v15 = vpop.f32.mrb[28].mxu0  ;;  %v1921_v20 = vpop.f32.mrb[28].mxu1 }
 0xe18   : > { %v1922_v16 = vadd.f32 %v2979_v14, %v1921_v20  ;;  %v3257_v17 = vpop.f32.mrb[29].mxu0  ;;  %v3273_v18 = vpop.f32.mrb[29].mxu1  ;;  %v1792_v35 = vadd.f32 %v2961_v33, %v1791_v15  ;;  %v3001_v15 = vld [vmem:[%s4275_s0 + $0x3] ss:$0 sm:$0xff]  ;;  %s4279_s0 = sld [smem:[#allocation21_spill]] }
 0xe19   : > { %v1794_v19 = vpop.f32.mrb[30].mxu0  ;;  %v1924_v21 = vpop.f32.mrb[30].mxu1 }
 0xe1a   : > { %v1989_v23 = vpack.c.bf16 %v1922_v16, %v1922_v16  ;;  %v3258_v24 = vpop.f32.mrb[31].mxu0  ;;  %v3274_v25 = vpop.f32.mrb[31].mxu1  ;;  %v1927_v37 = vpack.c.bf16 %v1792_v35, %v1792_v35 }
 0xe1c   : > { %v1994_v26 = vsel %vm1047_vm3, %v1989_v23, 0 }
 0xe1d   : > { %3282 = vmatpush3.bf16.msra.mxu1 %v1994_v26 }
 0xe1e   : > { %3295 = vmatprep.subr.bf16.mxu1 %v3552_v9 }
 0xe1f   : > { %v1856_v28 = vpop.f32.mrb[32].mxu0 }
 0xe20   : > { %v1857_v29 = vadd.f32 %v2970_v27, %v1856_v28  ;;  %v3265_v30 = vpop.f32.mrb[33].mxu0 }
 0xe21   : > { %v1859_v31 = vpop.f32.mrb[34].mxu0 }
 0xe22   : > { %v1928_v22 = vpack.c.bf16 %v1857_v29, %v1857_v29  ;;  %v3266_v32 = vpop.f32.mrb[35].mxu0 }
 0xe24   : > { %v1933_v34 = vsel %vm981_vm2, %v1928_v22, 0 }
 0xe25   : > { %3276 = vmatpush3.bf16.xpose.msra.mxu0 %v1933_v34 }
 0xe26   : > { %3287 = vmatprep.subr.bf16.mxu0 %v3552_v9 }
 0xe2c   : > { %3278 = vmatmul.mubr.msk.bf16.vlgmr.msra.gmra.mrb[36].mxu0 %vm981_vm2, %v1927_v37  ;;  %v3445_v37 = vld [vmem:[%s4219_s10 + $0x18] sm:$0xff]  }
 0xe2d   : > { %3288 = vmatpush3.bf16.msra.mxu0 %v3438_v36  ;;  %3291 = vmatprep.mubr.msk.bf16.mxu0 %vm3553_vm1, %v3552_v9 }
 0xe2e   : > { %3289 = vmatprep.subr.bf16.mxu0 %v3552_v9 }
 0xe31   : > { %3290 = vmatpush3.bf16.msra.mxu0 %v3439_v38 }
 0xe32   : > { %3303 = vmatprep.subr.bf16.mxu0 %v3552_v9 }
 0xe34   : > { %3292 = vmatmul.mubr.msk.bf16.vlgmr.msra.gmra.mrb[40].mxu0 %vm757_vm0, %v3971_v12 }
 0xe35   : > { %3304 = vmatpush3.bf16.msra.mxu0 %v3440_v39  ;;  %3307 = vmatprep.mubr.msk.bf16.mxu0 %vm3553_vm1, %v3552_v9 }
 0xe36   : > { %3305 = vmatprep.subr.bf16.mxu0 %v3552_v9 }
 0xe39   : > { %3306 = vmatpush3.bf16.msra.mxu0 %v3441_v40  ;;  %v3444_v40 = vld [vmem:[%s4219_s10 + $0x10] sm:$0xff]  }
 0xe3a   : > { %3317 = vmatprep.subr.bf16.mxu0 %v3552_v9 }
 0xe3c   : > { %3308 = vmatmul.mubr.msk.bf16.vlgmr.msra.gmra.mrb[44].mxu0 %vm757_vm0, %v3971_v12 }
 0xe3d   : > { %3319 = vmatprep.mubr.msk.bf16.mxu0 %vm3553_vm1, %v3552_v9 }
 0xeff   : > { %v1969_v41 = vpop.f32.mrb[36].mxu0 }
 0xf00   : > { %v1975_v42 = vmul.f32 0.25, %v1969_v41  ;;  %v3279_v43 = vpop.f32.mrb[37].mxu0 }
 0xf01   : > { %v1972_v44 = vpop.f32.mrb[38].mxu0 }
 0xf02   : > { %v3280_v45 = vpop.f32.mrb[39].mxu0  ;;  %v1976_v46 = vadd.f32 %v3836_v51, %v1975_v42 }
 0xf04   : > { %v1977_v47 = vsel %vm1030_vm4, %v1976_v46, -inf }
 0xf05   : > { %1978 = vmax.xlane.f32.xlu0 %v1977_v47 }
 0xf07   : > { %v2099_v48 = vpop.f32.mrb[40].mxu0 }
 0xf08   : > { %v3293_v49 = vpop.f32.mrb[41].mxu0 }
 0xf09   : > { %v2102_v50 = vpop.f32.mrb[42].mxu0 }
 0xf0a   : > { %v3294_v52 = vpop.f32.mrb[43].mxu0 }
 0xf0f   : > { %v2229_v54 = vpop.f32.mrb[44].mxu0 }
 0xf10   : > { %v2230_v55 = vadd.f32 %v3010_v53, %v2229_v54  ;;  %v3309_v56 = vpop.f32.mrb[45].mxu0  ;;  %v3023_v54 = vld [vmem:[%s4220_s11 + $0x1] ss:$0 sm:$0xff] }
 0xf11   : > { %v2232_v57 = vpop.f32.mrb[46].mxu0 }
 0xf12   : > { %v2297_v58 = vpack.c.bf16 %v2230_v55, %v2230_v55  ;;  %v3310_v59 = vpop.f32.mrb[47].mxu0 }
 0xf14   : > { %v2302_v60 = vsel %vm1047_vm3, %v2297_v58, 0 }
 0xf15   : > { %3318 = vmatpush3.bf16.msra.mxu0 %v2302_v60 }
 0xf16   : > { %3329 = vmatprep.subr.bf16.mxu0 %v3552_v9 }
 0xf92   : > { %v1979_v61 = vpop.xlane.xlu0 %1978 }
 0xf93   : > { %v1980_v62 = vsub.f32 %v1976_v46, %v1979_v61 }
 0xf95   : > { %v1981_v63 = vmul.f32 1.442695, %v1980_v62 }
 0xf97   : > { %3472 = vpow2.f32 %v1981_v63 }
 0xfa1   : > { %v3473_v0 = vpop.eup %3472 }
 0xfa2   : > { %v1983_v1 = vsel %vm1030_vm4, %v3473_v0, 0.0 }
 0xfa3   : > { %1984 = vadd.xlane.f32.xlu1 %v1983_v1 }
0x1030   : > { %v1985_v2 = vpop.xlane.xlu1 %1984 }
0x1031   : > { %3474 = vrcp.f32 %v1985_v2 }
0x103b   : > { %v3475_v3 = vpop.eup %3474 }
0x103c   : > { %v1987_v4 = vmul.f32 %v3475_v3, %v3473_v0  ;;  %v3446_v3 = vld [vmem:[%s4223_s14 + $0x10] sm:$0xff]  }
0x103e   : > { %v1988_v6 = vpack.c.bf16 %v1987_v4, %v1987_v4 }
0x1040   : > { %3284 = vmatmul.mubr.msk.bf16.vlgmr.msra.gmra.mrb[32].mxu1 %vm1030_vm4, %v1988_v6 }
0x1041   : > { %3296 = vmatpush3.bf16.msra.mxu1 %v3442_v5  ;;  %3299 = vmatprep.mubr.msk.bf16.mxu1 %vm3553_vm1, %v3552_v9 }
0x1042   : > { %3297 = vmatprep.subr.bf16.mxu1 %v3552_v9 }
0x1045   : > { %3298 = vmatpush3.bf16.msra.mxu1 %v3443_v7 }
0x1046   : > { %3311 = vmatprep.subr.bf16.mxu1 %v3552_v9 }
0x1048   : > { %3300 = vmatmul.mubr.msk.bf16.vlgmr.msra.gmra.mrb[36].mxu1 %vm757_vm0, %v3971_v12  ;;  %v2992_v12 = vld [vmem:[%s4276_s1 + $0x3] ss:$0 sm:$0xff]  ;;  %s4167_s1 = scalar_lea.hbm %s4279_s0, %s3062_s4 }
0x1049   : > { %3313 = vmatprep.mubr.msk.bf16.mxu1 %vm3553_vm1, %v3552_v9  ;;  %v2100_v24 = vadd.f32 %v2992_v12, %v2099_v48 }
0x104b   : > { %v2235_v25 = vpack.c.bf16 %v2100_v24, %v2100_v24 }
0x1113   : > { %v2030_v8 = vpop.f32.mrb[32].mxu1 }
0x1114   : > { %v3285_v11 = vpop.f32.mrb[33].mxu1  ;;  %v2036_v42 = vpack.c.bf16 %v2030_v8, %v2030_v8  ;;  %v3026_v8 = vld [vmem:[%s4221_s12 + $0x1] ss:$0 sm:$0xff] }
0x1115   : > { %v2033_v13 = vpop.f32.mrb[34].mxu1 }
0x1116   : > { %v3286_v14 = vpop.f32.mrb[35].mxu1  ;;  %v3027_v13 = vld [vmem:[%s4222_s13 + $0x1] ss:$0 sm:$0xff] }
0x111b   : > { %v2164_v20 = vpop.f32.mrb[36].mxu1 }
0x111c   : > { %v2165_v16 = vadd.f32 %v3001_v15, %v2164_v20  ;;  %v3301_v17 = vpop.f32.mrb[37].mxu1 }
0x111d   : > { %v2167_v18 = vpop.f32.mrb[38].mxu1  ;;  %v3449_v17 = vld [vmem:[%s4225_s16 + $0x28] sm:$0xff]  }
0x111e   : > { %v2236_v19 = vpack.c.bf16 %v2165_v16, %v2165_v16  ;;  %v3302_v21 = vpop.f32.mrb[39].mxu1  ;;  %v3448_v16 = vld [vmem:[%s4225_s16 + $0x20] sm:$0xff]   ;;  %v3450_v18 = vld [vmem:[%s4225_s16 + $0x30] sm:$0xff]  }
0x111f   : > { %v3033_v21 = vld [vmem:[%s4224_s15 + $0x1] ss:$0 sm:$0xff] }
0x1120   : > { %v2241_v23 = vsel %vm981_vm2, %v2236_v19, 0  ;;  %v3451_v19 = vld [vmem:[%s4225_s16 + $0x38] sm:$0xff]  }
0x1121   : > { %3312 = vmatpush3.bf16.xpose.msra.mxu1 %v2241_v23 }
0x1122   : > { %3323 = vmatprep.subr.bf16.mxu1 %v3552_v9 }
0x1128   : > { %3314 = vmatmul.mubr.msk.bf16.vlgmr.msra.gmra.mrb[40].mxu1 %vm981_vm2, %v2235_v25 }
0x1129   : > { %3325 = vmatprep.mubr.msk.bf16.mxu1 %vm3553_vm1, %v3552_v9  ;;  %3324 = vmatpush3.bf16.msra.mxu1 %v3445_v37 }
0x112a   : > { %3335 = vmatprep.subr.bf16.mxu1 %v3552_v9 }
0x11fb   : > { %v2277_v26 = vpop.f32.mrb[40].mxu1 }
0x11fc   : > { %v2283_v27 = vmul.f32 0.25, %v2277_v26  ;;  %v3315_v28 = vpop.f32.mrb[41].mxu1 }
0x11fd   : > { %v2280_v29 = vpop.f32.mrb[42].mxu1 }
0x11fe   : > { %v3316_v30 = vpop.f32.mrb[43].mxu1  ;;  %v2284_v31 = vadd.f32 %v3836_v51, %v2283_v27 }
0x1200   : > { %v2285_v22 = vsel %vm1030_vm4, %v2284_v31, -inf }
0x1201   : > { %2286 = vmax.xlane.f32.xlu0 %v2285_v22 }
0x128e   : > { %v2287_v32 = vpop.xlane.xlu0 %2286 }
0x128f   : > { %v2288_v33 = vsub.f32 %v2284_v31, %v2287_v32 }
0x1291   : > { %v2289_v34 = vmul.f32 1.442695, %v2288_v33 }
0x1293   : > { %3476 = vpow2.f32 %v2289_v34 }
0x129d   : > { %v3477_v35 = vpop.eup %3476 }
0x129e   : > { %v2291_v36 = vsel %vm1030_vm4, %v3477_v35, 0.0 }
0x129f   : > { %2292 = vadd.xlane.f32.xlu1 %v2291_v36  ;;  %v3046_v36 = vld [vmem:[%s4226_s17 + $0x1] ss:$0 sm:$0xff] }
0x132c   : > { %v2293_v38 = vpop.xlane.xlu1 %2292 }
0x132d   : > { %3478 = vrcp.f32 %v2293_v38 }
0x1337   : > { %v3479_v51 = vpop.eup %3478 }
0x1338   : > { %v2295_v39 = vmul.f32 %v3479_v51, %v3477_v35 }
0x133a   : > { %v2296_v41 = vpack.c.bf16 %v2295_v39, %v2295_v39 }
0x133c   : > { %3320 = vmatmul.mubr.msk.bf16.vlgmr.msra.gmra.mrb[48].mxu0 %vm1030_vm4, %v2296_v41 }
0x133d   : > { %3330 = vmatpush3.bf16.msra.mxu0 %v3444_v40  ;;  %3331 = vmatprep.mubr.msk.bf16.mxu0 %vm3553_vm1, %v3552_v9 }
0x133e   : > { %3343 = vmatprep.subr.bf16.mxu0 %v3552_v9 }
0x1344   : > { %3332 = vmatmul.mubr.msk.bf16.vlgmr.msra.gmra.mrb[52].mxu0 %vm981_vm2, %v2036_v42 }
0x1345   : > { %3351 = vmatprep.mubr.msk.bf16.mxu0 %vm3553_vm1, %v3552_v9  ;;  %3344 = vmatpush3.bf16.msra.mxu0 %v3448_v16 }
0x1346   : > { %3345 = vmatprep.subr.bf16.mxu0 %v3552_v9 }
0x1349   : > { %3346 = vmatpush3.bf16.msra.mxu0 %v3449_v17 }
0x134a   : > { %3347 = vmatprep.subr.bf16.mxu0 %v3552_v9 }
0x134d   : > { %3348 = vmatpush3.bf16.msra.mxu0 %v3450_v18 }
0x134e   : > { %3349 = vmatprep.subr.bf16.mxu0 %v3552_v9 }
0x1351   : > { %3350 = vmatpush3.bf16.msra.mxu0 %v3451_v19 }
0x140f   : > { %v2338_v43 = vpop.f32.mrb[48].mxu0 }
0x1410   : > { %v2344_v44 = vpack.c.bf16 %v2338_v43, %v2338_v43  ;;  %v3321_v45 = vpop.f32.mrb[49].mxu0 }
0x1411   : > { %v2341_v46 = vpop.f32.mrb[50].mxu0 }
0x1412   : > { %v3322_v47 = vpop.f32.mrb[51].mxu0  ;;  %3326 = vmatmul.mubr.msk.bf16.vlgmr.msra.gmra.mrb[44].mxu1 %vm981_vm2, %v2344_v44 }
0x1413   : > { %3339 = vmatprep.mubr.msk.bf16.mxu1 %vm3553_vm1, %v3552_v9  ;;  %3336 = vmatpush3.bf16.msra.mxu1 %v3446_v3 }
0x1414   : > { %3337 = vmatprep.subr.bf16.mxu1 %v3552_v9 }
0x1417   : > { %v2440_v48 = vpop.f32.mrb[52].mxu0 }
0x1418   : > { %v3333_v49 = vpop.f32.mrb[53].mxu0 }
0x1419   : > { %v2443_v50 = vpop.f32.mrb[54].mxu0  ;;  %v3453_v49 = vld [vmem:[%s4229_s20 + $0x8] sm:$0xff]  }
0x141a   : > { %v3334_v52 = vpop.f32.mrb[55].mxu0 }
0x14e5   : > { %v2391_v53 = vpop.f32.mrb[44].mxu1 }
0x14e6   : > { %v2441_v55 = vadd.f32 %v2440_v48, %v2391_v53  ;;  %v3327_v56 = vpop.f32.mrb[45].mxu1  ;;  %v3452_v48 = vld [vmem:[%s4229_s20] sm:$0xff]  }
0x14e7   : > { %v2394_v57 = vpop.f32.mrb[46].mxu1 }
0x14e8   : > { %v2454_v58 = vadd.f32 %v3023_v54, %v2441_v55  ;;  %v3328_v59 = vpop.f32.mrb[47].mxu1  ;;  %v3054_v55 = vld [vmem:[%s4227_s18 + $0x1] ss:$0 sm:$0xff] }
0x14e9   : > { %v3055_v57 = vld [vmem:[%s4228_s19 + $0x1] ss:$0 sm:$0xff] }
0x14ea   : > { %v2455_v60 = vadd.f32 %v2454_v58, %v3964_v10  ;;  %v3447_v10 = vld [vmem:[%s4223_s14 + $0x18] sm:$0xff]  }
0x14eb   : > { %3338 = vmatpush3.bf16.msra.mxu1 %v3447_v10 }
0x14ec   : > { %v2460_v61 = vsel %vm757_vm0, %v2455_v60, 0.0  ;;  %3355 = vmatprep.subr.bf16.mxu1 %v3552_v9 }
0x14ed   : > { %2461 = vadd.xlane.f32.xlu0 %v2460_v61  ;;  %v3454_v61 = vld [vmem:[%s4231_s22] sm:$0xff]  }
0x157a   : > { %v2462_v62 = vpop.xlane.xlu0 %2461 }
0x157b   : > { %v2463_v63 = vmul.f32 0.03125, %v2462_v62  ;;  %v3455_v62 = vld [vmem:[%s4231_s22 + $0x8] sm:$0xff]  }
0x157d   : > { %v2464_v0 = vsub.f32 %v2455_v60, %v2463_v63  ;;  %v2687_v63 = vld [vmem:[%s4230_s21] sm:$0x1] }
0x157f   : > { %v2465_v1 = vmul.f32 %v2464_v0, %v2464_v0 }
0x1581   : > { %v2466_v2 = vsel %vm757_vm0, %v2465_v1, 0.0 }
0x1582   : > { %2467 = vadd.xlane.f32.xlu1 %v2466_v2 }
0x160f   : > { %v2468_v4 = vpop.xlane.xlu1 %2467 }
0x1610   : > { %v2469_v5 = vmul.f32 0.03125, %v2468_v4 }
0x1612   : > { %v2470_v6 = vadd.f32 1e-12, %v2469_v5 }
0x1614   : > { %3480 = vrsqrt.f32 %v2470_v6 }
0x161e   : > { %v3481_v7 = vpop.eup %3480 }
0x161f   : > { %v2472_v11 = vmul.f32 %v3481_v7, %v2464_v0 }
0x1621   : > { %v2479_v14 = vmul.f32 %v3026_v8, %v2472_v11 }
0x1623   : > { %v2486_v15 = vadd.f32 %v3027_v13, %v2479_v14 }
0x1625   : > { %v2487_v20 = vpack.c.bf16 %v2486_v15, %v2486_v15 }
0x1627   : > { %3340 = vmatmul.mubr.msk.bf16.vlgmr.msra.gmra.mrb[48].mxu1 %vm757_vm0, %v2487_v20 }
0x1628   : > { %3359 = vmatprep.mubr.msk.bf16.mxu1 %vm3553_vm1, %v3552_v9  ;;  %3356 = vmatpush3.bf16.msra.mxu1 %v3452_v48 }
0x1629   : > { %3357 = vmatprep.subr.bf16.mxu1 %v3552_v9 }
0x162c   : > { %3358 = vmatpush3.bf16.msra.mxu1 %v3453_v49 }
0x162d   : > { %3363 = vmatprep.subr.bf16.mxu1 %v3552_v9 }
0x16fa   : > { %v2550_v12 = vpop.f32.mrb[48].mxu1 }
0x16fb   : > { %v2551_v23 = vadd.f32 %v3033_v21, %v2550_v12  ;;  %v3341_v24 = vpop.f32.mrb[49].mxu1 }
0x16fc   : > { %v2553_v25 = vpop.f32.mrb[50].mxu1 }
0x16fd   : > { %v2557_v26 = vmul.f32 0.044715, %v2551_v23  ;;  %v3342_v27 = vpop.f32.mrb[51].mxu1  ;;  %v2556_v32 = vmul.f32 0.5, %v2551_v23 }
0x16ff   : > { %v2558_v28 = vmul.f32 %v2557_v26, %v2551_v23 }
0x1701   : > { %v2559_v29 = vmul.f32 %v2558_v28, %v2551_v23 }
0x1703   : > { %v2560_v30 = vadd.f32 %v2559_v29, %v2551_v23 }
0x1705   : > { %v2561_v31 = vmul.f32 0.7978846, %v2560_v30 }
0x1707   : > { %3482 = vtanh.f32 %v2561_v31 }
0x1711   : > { %v3483_v22 = vpop.eup %3482 }
0x1712   : > { %v2563_v33 = vadd.f32 1.0, %v3483_v22 }
0x1714   : > { %v2564_v34 = vmul.f32 %v2563_v33, %v2556_v32 }
0x1716   : > { %v2565_v35 = vpack.c.bf16 %v2564_v34, %v2564_v34 }
0x1718   : > { %3352 = vmatmul.mubr.msk.bf16.vlgmr.msra.gmra.mrb[56].mxu0 %vm1654_vm5, %v2565_v35 }
0x17eb   : > { %v2644_v37 = vpop.f32.mrb[56].mxu0 }
0x17ec   : > { %v2645_v38 = vadd.f32 %v3046_v36, %v2644_v37  ;;  %v3353_v51 = vpop.f32.mrb[57].mxu0 }
0x17ed   : > { %v2647_v39 = vpop.f32.mrb[58].mxu0 }
0x17ee   : > { %v3354_v40 = vpop.f32.mrb[59].mxu0  ;;  %v2650_v41 = vadd.f32 %v2645_v38, %v2486_v15 }
0x17f0   : > { %v2655_v42 = vsel %vm757_vm0, %v2650_v41, 0.0 }
0x17f1   : > { %2656 = vadd.xlane.f32.xlu0 %v2655_v42 }
0x187e   : > { %v2657_v43 = vpop.xlane.xlu0 %2656 }
0x187f   : > { %v2658_v44 = vmul.f32 0.03125, %v2657_v43 }
0x1881   : > { %v2659_v45 = vsub.f32 %v2650_v41, %v2658_v44 }
0x1883   : > { %v2660_v46 = vmul.f32 %v2659_v45, %v2659_v45 }
0x1885   : > { %v2661_v47 = vsel %vm757_vm0, %v2660_v46, 0.0 }
0x1886   : > { %2662 = vadd.xlane.f32.xlu1 %v2661_v47 }
0x1913   : > { %v2663_v50 = vpop.xlane.xlu1 %2662 }
0x1914   : > { %v2664_v52 = vmul.f32 0.03125, %v2663_v50 }
0x1916   : > { %v2665_v53 = vadd.f32 1e-12, %v2664_v52 }
0x1918   : > { %3484 = vrsqrt.f32 %v2665_v53 }
0x1922   : > { %v3485_v54 = vpop.eup %3484 }
0x1923   : > { %v2667_v56 = vmul.f32 %v3485_v54, %v2659_v45 }
0x1925   : > { %v2674_v58 = vmul.f32 %v3054_v55, %v2667_v56 }
0x1927   : > { %v2681_v59 = vadd.f32 %v3055_v57, %v2674_v58 }
0x1929   : > { %v2682_v60 = vpack.c.bf16 %v2681_v59, %v2681_v59 }
0x192b   : > { %3360 = vmatmul.mubr.msk.bf16.vlgmr.msra.gmra.mrb[52].mxu1 %vm757_vm0, %v2682_v60 }
0x192c   : > { %3367 = vmatprep.mubr.msk.bf16.mxu1 %vm3553_vm1, %v3552_v9  ;;  %3364 = vmatpush3.bf16.msra.mxu1 %v3454_v61 }
0x192d   : > { %3365 = vmatprep.subr.bf16.mxu1 %v3552_v9  ;;  %v2749_v9 = vld [vmem:[%s4232_s23] sm:$0x1] }
0x1930   : > { %3366 = vmatpush3.bf16.msra.mxu1 %v3455_v62 }
0x19fe   : > { %v2737_v0 = vpop.f32.mrb[52].mxu1 }
0x19ff   : > { %v2738_v1 = vadd.f32 %v2737_v0, %v2687_v63  ;;  %v3361_v2 = vpop.f32.mrb[53].mxu1 }
0x1a00   : > { %v2740_v3 = vpop.f32.mrb[54].mxu1 }
0x1a01   : > { %3486 = vtanh.f32 %v2738_v1  ;;  %v3362_v10 = vpop.f32.mrb[55].mxu1 }
0x1a0b   : > { %v3487_v4 = vpop.eup %3486 }
0x1a0c   : > { %v2744_v5 = vpack.c.bf16 %v3487_v4, %v3487_v4 }
0x1a0e   : > { %3368 = vmatmul.mubr.msk.bf16.vlgmr.msra.gmra.mrb[56].mxu1 %vm757_vm0, %v2744_v5 }
0x1ae1   : > { %v2799_v6 = vpop.f32.mrb[56].mxu1 }
0x1ae2   : > { %v2800_v7 = vadd.f32 %v2799_v6, %v2749_v9  ;;  %v3369_v8 = vpop.f32.mrb[57].mxu1 }
0x1ae3   : > { %v2802_v11 = vpop.f32.mrb[58].mxu1 }
0x1ae4   : > { %v3370_v13 = vpop.f32.mrb[59].mxu1  ;;  %2806 = vst.msk [vmem:[%s738_s27] sm:$0x1] %vm2805_vm6, %v2800_v7 }
0x1ae5   : > { %3501 = shalt.err (!%p3498_p3)
}
0x1ae6   : > { %s3502_s25 = scalar_lea.hbm %s4167_s1, 16  ;;  %s3506_s28 = scalar_lea.hbm %s4279_s0, 32 }
0x1ae7   : > { %p3503_p4 = scmp.ne.s32.totalorder %s4167_s1, %s3502_s25  ;;  %p3507_p9 = scmp.lt.u32.totalorder %s4167_s1, %s4279_s0 }
0x1ae8   : > { %p3508_p10 = scmp.lt.u32.totalorder %s3506_s28, %s3502_s25  ;;  %p3510_p12 = scmp.lt.u32.totalorder %s3502_s25, %s4167_s1 }
0x1ae9   : > { %p3504_p7 = pnand %p3503_p4, %p3718_p5 }
0x1aea   : > { %p3509_p11 = por %p3508_p10, %p3507_p9 }
0x1aeb   : > { %p3505_p8 = pneg %p3504_p7 }
0x1aec   : > { %p3511_p13 = por %p3510_p12, %p3509_p11 }
0x1aee   : > { %p3512_p0 = pnand %p3511_p13, %p3505_p8 }
0x1af0   : > { %3515 = shalt.err (!%p3512_p0)
}
0x1af1   : > { %3371 = dma.vmem_to_hbm [thread:$0]  (%p3718_p5), %s4169_s5, 16, %s4167_s1, %s2808_s6  }
0x1af2 PF: > { %s4280_s2 = sld [smem:[#allocation7_spill]]  ;;  %s4281_s8 = sld [smem:[#allocation5_spill]] }
0x1af8   : > { %p3377_p1 = scmp.ge.s32.totalorder %s4280_s2, 2  ;;  %s2832_s27 = sand.u32 1, %s4281_s8  }
0x1af9   : > { %s2833_s7 = scalar_lea.sflag [#allocation3], %s2832_s27 }
0x1afa   : > { %p3374_p2 = pnand %p3377_p1, %p3722_p6 }
0x1afc   : > { %3533 = dma.done.wait (!%p3374_p2), %s2833_s7, 16  }
0x1afd   : > { %3535 = vsyncadd (!%p3374_p2), %s2833_s7, 4294967280  ;;  %s4283_s28 = sld [smem:[#allocation8_spill]]  ;;  %s4284_s25 = sld [smem:[#allocation6_spill]] }
0x1afe   : > { %s4285_s27 = sld [smem:[#allocation9_spill]]  ;;  %s4286_s5 = smov %s3542_s26 }
0x1b03   : > { %p34_p3 = scmp.ge.s32.totalorder %s4283_s28, 4   ;;  %s4287_s26 = smov %s4284_s25 }
0x1b05   :  { %36 = sbr.rel (!%p34_p3) target bundleno = 15 (0xf), region = 184 }
0x1b0c   :  { %2837 = vsyncpa [#allocation3], 1 }
0x1b0d   :  { %2839 = vsyncpa [#allocation3 + $0x1], 1 }

</bundles_post_ra>
